<compile_context>
chip_gen: v7x
topology: tpu7x:2x2x1
jax: 0.10.0
libtpu: 0.0.40
codegen_flags: <defaults>
</compile_context>

<pallas_src>
import functools

import jax
import jax.numpy as jnp
import numpy as np
from jax.experimental import pallas as pl
from jax.experimental.pallas import tpu as pltpu


def _round_up(x, m):
    return (x + m - 1) // m * m


# ----------------------------------------------------------------------------
# Fused GIN-stack Pallas kernel
# ----------------------------------------------------------------------------
def _gin_stack_kernel(Kc, N_pad, Dp, n_layers,
                      eps_ref, x0_hbm, a_hbm, w1_ref, b1_ref, w2_ref, b2_ref,
                      o_ref, x_buf, a_buf, copy_sem):
    """Grid = (basis_chunk, layer).  x_buf is the node-major bf16 feature slab
    [N_pad, Kc*Dp] for this chunk; a_buf is the resident bf16 adjacency.
    Per layer, per 128-lane basis slice k:
        z_k = (1+eps)*x_k + A @ x_k            (bf16 MXU, f32 accumulate)
        x_k = MLP(z_k) = relu(z_k@W1 + b1)@W2 + b2
    The last layer also accumulates sum_k x_k (PE.sum(dim=1)) into o_ref."""
    c = pl.program_id(0)
    l = pl.program_id(1)

    # One-shot load of this chunk's initial features + the (shared) adjacency.
    @pl.when(l == 0)
    def _load():
        cp_x = pltpu.make_async_copy(x0_hbm.at[c], x_buf, copy_sem.at[0])
        cp_a = pltpu.make_async_copy(a_hbm, a_buf, copy_sem.at[1])
        cp_x.start()
        cp_a.start()
        cp_x.wait()
        cp_a.wait()

    a = a_buf[...]                                    # [N_pad, N_pad] bf16, VMEM-resident
    one_eps = 1.0 + eps_ref[l]                        # f32 scalar from SMEM
    w1 = w1_ref[...]                                  # [Dp, Dp] bf16 (pipelined per layer)
    b1 = b1_ref[...]                                  # [1, Dp]  f32
    w2 = w2_ref[...]
    b2 = b2_ref[...]

    # Per-basis-slice fusion: aggregation + MLP, no full-size Z slab.
    # TODO(synk): for N_pad > 512, additionally tile these matmuls over node-row chunks.
    acc = None
    for k in range(Kc):                               # Kc small & static -> unrolled
        xk = x_buf[:, k * Dp:(k + 1) * Dp]            # [N_pad, Dp] bf16
        agg = jnp.dot(a, xk, preferred_element_type=jnp.float32)
        z = one_eps * xk.astype(jnp.float32) + agg
        h = jnp.maximum(
            jnp.dot(z.astype(jnp.bfloat16), w1, preferred_element_type=jnp.float32) + b1,
            0.0)
        y = jnp.dot(h.astype(jnp.bfloat16), w2, preferred_element_type=jnp.float32) + b2
        x_buf[:, k * Dp:(k + 1) * Dp] = y.astype(x_buf.dtype)
        acc = y if acc is None else acc + y           # basis-sum epilogue, fused (cheap VPU adds)

    @pl.when(l == n_layers - 1)
    def _final():
        o_ref[...] = acc                              # per-chunk partial PE.sum(dim=1)


# ----------------------------------------------------------------------------
# GINPhi forward (wrapper: padding / packing in plain JAX, hot path in Pallas)
# ----------------------------------------------------------------------------
def gin_phi_forward(W_list, edge_index, layer_params):
    """W_list: list of [N_i, K, M]; edge_index: [2, E] int32; returns [N_sum, out_dims]."""
    W = jnp.concatenate(W_list, axis=0).astype(jnp.float32)     # [N, K, M]
    N, K, M = W.shape
    L = len(layer_params)
    H = layer_params[0][0].shape[1]
    O = layer_params[-1][2].shape[1]

    Dp = _round_up(max(M, H, O), 128)     # lane-dense feature width shared by all layers
    N_pad = _round_up(N, 128)             # 128-aligned: full-depth MXU contraction, tile-aligned A

    n_chunks = 2 if (K % 2 == 0 and K >= 2) else 1   # megacore split over the basis axis
    Kc = K // n_chunks

    # Dense adjacency (aggr[i] = sum over edges src->dst=i of X[src]), zero-padded, bf16
    # (edge counts are small integers -> exactly representable).
    # TODO(synk): exploit the per-graph block-diagonal structure for large batches.
    A = jnp.zeros((N_pad, N_pad), jnp.float32)
    A = A.at[edge_index[1], edge_index[0]].add(1.0)
    A = A.astype(jnp.bfloat16)

    # Node-major, basis-chunked feature slab: x0[c, n, k*Dp + d] = W[n, c*Kc + k, d].
    Wc = W.reshape(N, n_chunks, Kc, M).transpose(1, 0, 2, 3)    # [n_chunks, N, Kc, M]
    x0 = jnp.zeros((n_chunks, N_pad, Kc, Dp), jnp.float32)
    x0 = x0.at[:, :N, :, :M].set(Wc)
    x0 = x0.reshape(n_chunks, N_pad, Kc * Dp).astype(jnp.bfloat16)

    # Stack zero-padded per-layer MLP params (weights bf16 for the MXU, biases f32).
    w1s = jnp.zeros((L, Dp, Dp), jnp.float32)
    b1s = jnp.zeros((L, 1, Dp), jnp.float32)
    w2s = jnp.zeros((L, Dp, Dp), jnp.float32)
    b2s = jnp.zeros((L, 1, Dp), jnp.float32)
    eps_arr = jnp.zeros((L,), jnp.float32)
    for l, (w1, b1, w2, b2, eps) in enumerate(layer_params):
        w1s = w1s.at[l, :w1.shape[0], :w1.shape[1]].set(w1.astype(jnp.float32))
        b1s = b1s.at[l, :, :b1.shape[1]].set(b1.astype(jnp.float32))
        w2s = w2s.at[l, :w2.shape[0], :w2.shape[1]].set(w2.astype(jnp.float32))
        b2s = b2s.at[l, :, :b2.shape[1]].set(b2.astype(jnp.float32))
        eps_arr = eps_arr.at[l].set(float(eps))   # TODO(synk): traced/learned eps not supported
    w1s = w1s.astype(jnp.bfloat16)
    w2s = w2s.astype(jnp.bfloat16)

    flops = L * n_chunks * Kc * (2 * N_pad * N_pad * Dp + 4 * N_pad * Dp * Dp)
    bytes_accessed = (2 * n_chunks * N_pad * Kc * Dp          # x0 (bf16)
                      + 2 * N_pad * N_pad                     # A  (bf16)
                      + L * (2 * 2 * Dp * Dp + 2 * 4 * Dp)    # weights + biases
                      + 4 * n_chunks * N_pad * Dp)            # output (f32)

    # VMEM budget: x_buf + a_buf + double-buffered weights/biases + output block, with headroom.
    vmem_need = (2 * N_pad * Kc * Dp + 2 * N_pad * N_pad
                 + 2 * (2 * 2 * Dp * Dp + 2 * 4 * Dp) + 4 * N_pad * Dp)
    vmem_limit = int(min(64 * 1024 * 1024, max(4 * 1024 * 1024, 2 * vmem_need)))

    out = pl.pallas_call(
        functools.partial(_gin_stack_kernel, Kc, N_pad, Dp, L),
        out_shape=jax.ShapeDtypeStruct((n_chunks, N_pad, Dp), jnp.float32),
        grid=(n_chunks, L),
        in_specs=[
            pl.BlockSpec(memory_space=pltpu.MemorySpace.SMEM),       # eps per layer [L]
            pl.BlockSpec(memory_space=pl.ANY),                       # x0 (manual one-shot DMA)
            pl.BlockSpec(memory_space=pl.ANY),                       # A  (manual one-shot DMA)
            pl.BlockSpec((None, Dp, Dp), lambda c, l: (l, 0, 0)),    # W1[l]  (pipelined)
            pl.BlockSpec((None, 1, Dp), lambda c, l: (l, 0, 0)),     # b1[l]
            pl.BlockSpec((None, Dp, Dp), lambda c, l: (l, 0, 0)),    # W2[l]
            pl.BlockSpec((None, 1, Dp), lambda c, l: (l, 0, 0)),     # b2[l]
        ],
        out_specs=pl.BlockSpec((None, N_pad, Dp), lambda c, l: (c, 0, 0)),
        scratch_shapes=[
            pltpu.VMEM((N_pad, Kc * Dp), jnp.bfloat16),   # evolving feature slab (this chunk)
            pltpu.VMEM((N_pad, N_pad), jnp.bfloat16),     # adjacency, resident across layers
            pltpu.SemaphoreType.DMA((2,)),                # x0 / A load semaphores
        ],
        compiler_params=pltpu.CompilerParams(
            dimension_semantics=("parallel", "arbitrary"),   # chunk axis -> both TCs on v7x
            vmem_limit_bytes=vmem_limit),
        cost_estimate=pl.CostEstimate(flops=int(flops), transcendentals=0,
                                      bytes_accessed=int(bytes_accessed)),
    )(eps_arr, x0, A, w1s, b1s, w2s, b2s)

    # Sum the per-chunk partial basis-sums, strip node/feature padding.
    return out.sum(axis=0)[:N, :O]


# Pure-JAX reference (mirrors the PyTorch semantics) for a correctness check.
def gin_phi_reference(W_list, edge_index, layer_params):
    W = jnp.concatenate(W_list, axis=0).astype(jnp.float32)
    N_sum = W.shape[0]
    A = jnp.zeros((N_sum, N_sum), jnp.float32).at[edge_index[1], edge_index[0]].add(1.0)
    x = W
    for (w1, b1, w2, b2, eps) in layer_params:
        agg = jnp.einsum('ij,jkd->ikd', A, x)
        z = (1.0 + eps) * x + agg
        h = jnp.maximum(jnp.einsum('nkd,de->nke', z, w1) + b1[0], 0.0)
        x = jnp.einsum('nkd,de->nke', h, w2) + b2[0]
    return x.sum(axis=1)


# ----------------------------------------------------------------------------
# Deterministic parameter init (synthetic; shapes follow GINPhi.__init__)
# ----------------------------------------------------------------------------
def init_params(key, n_layers, in_dims, hidden_dims, out_dims):
    """Each GIN layer owns eps and a 2-layer MLP: Linear -> ReLU -> Linear (bias, bn=False)."""
    params = []
    d_in = in_dims
    for l in range(n_layers):
        d_out = out_dims if l == n_layers - 1 else hidden_dims
        key, k1, k2 = jax.random.split(key, 3)
        w1 = 0.1 * jax.random.normal(k1, (d_in, hidden_dims), jnp.float32)
        b1 = jnp.full((1, hidden_dims), 0.01, jnp.float32)
        w2 = 0.1 * jax.random.normal(k2, (hidden_dims, d_out), jnp.float32)
        b2 = jnp.full((1, d_out), -0.02, jnp.float32)
        eps = 0.1 * (l + 1)        # deterministic stand-in for the learned eps parameter
        params.append((w1, b1, w2, b2, eps))
        d_in = d_out
    return params


if __name__ == "__main__":
    key = jax.random.PRNGKey(0)

    # Two graphs, 8 nodes each -> W_list entries [N_i, N_i, M] with N_i = K = 8
    n_graphs, n_per_graph, K, M = 2, 8, 8, 4
    n_layers, hidden_dims, out_dims = 2, 32, 16

    key, kw0, kw1 = jax.random.split(key, 3)
    W_list = [
        jax.random.normal(kw0, (n_per_graph, K, M), jnp.float32),
        jax.random.normal(kw1, (n_per_graph, K, M), jnp.float32),
    ]

    # Bidirectional ring edges inside each graph, COO format [2, E_sum]
    srcs, dsts = [], []
    for g in range(n_graphs):
        off = g * n_per_graph
        for i in range(n_per_graph):
            j = (i + 1) % n_per_graph
            srcs += [off + i, off + j]
            dsts += [off + j, off + i]
    edge_index = jnp.array([srcs, dsts], dtype=jnp.int32)   # [2, 32]

    params = init_params(key, n_layers, M, hidden_dims, out_dims)

    pe = gin_phi_forward(W_list, edge_index, params)
    pe = jax.block_until_ready(pe)

    pe_ref = gin_phi_reference(W_list, edge_index, params)
    # bf16 MXU feeds with f32 accumulation -> loosened tolerances vs the f32 reference.
    np.testing.assert_allclose(np.asarray(pe), np.asarray(pe_ref), rtol=5e-2, atol=5e-2)
    assert pe.shape == (n_graphs * n_per_graph, out_dims)

    print("KERNEL_OK")
</pallas_src>

<mosaic_0001>
module attributes {stable_mosaic.version = 11 : i64} {
  func.func @_gin_stack_kernel(%arg0: i32, %arg1: i32, %arg2: memref<2xf32, #tpu.memory_space<smem>>, %arg3: memref<2x128x512xbf16, #tpu.memory_space<any>>, %arg4: memref<128x128xbf16, #tpu.memory_space<any>>, %arg5: memref<1x128x128xbf16, #tpu.memory_space<vmem>>, %arg6: memref<1x1x128xf32, #tpu.memory_space<vmem>>, %arg7: memref<1x128x128xbf16, #tpu.memory_space<vmem>>, %arg8: memref<1x1x128xf32, #tpu.memory_space<vmem>>, %arg9: memref<1x128x128xf32, #tpu.memory_space<vmem>>, %arg10: memref<128x512xbf16, #tpu.memory_space<vmem>>, %arg11: memref<128x128xbf16, #tpu.memory_space<vmem>>, %arg12: memref<2x!tpu.dma_semaphore, #tpu.memory_space<semaphore_mem>>) attributes {dimension_semantics = [#tpu.dimension_semantics<parallel>, #tpu.dimension_semantics<arbitrary>], iteration_bounds = array<i64: 2, 2>, scalar_prefetch = 0 : i64, scratch_operands = 3 : i64, tpu.core_type = #tpu.core_type<tc>, window_params = [{transform_indices = @transform_0, window_bounds = array<i64: 2>}, {}, {}, {transform_indices = @transform_3, window_bounds = array<i64: 1, 128, 128>}, {transform_indices = @transform_4, window_bounds = array<i64: 1, 1, 128>}, {transform_indices = @transform_5, window_bounds = array<i64: 1, 128, 128>}, {transform_indices = @transform_6, window_bounds = array<i64: 1, 1, 128>}, {transform_indices = @transform_7, window_bounds = array<i64: 1, 128, 128>}]} {
    %c0_i32 = arith.constant 0 : i32
    %0 = arith.cmpi eq, %arg1, %c0_i32 : i32
    %1 = arith.extui %0 : i1 to i32
    %c0_i32_0 = arith.constant 0 : i32
    %2 = arith.cmpi ne, %1, %c0_i32_0 : i32
    scf.if %2 {
      %c0_i32_44 = arith.constant 0 : i32
      %c0_i32_45 = arith.constant 0 : i32
      %c0_i32_46 = arith.constant 0 : i32
      %93 = tpu.memref_slice %arg3[%arg0, %c0_i32_45, %c0_i32_46] : memref<2x128x512xbf16, #tpu.memory_space<any>> -> memref<1x128x512xbf16, #tpu.memory_space<any>>
      %94 = tpu.memref_squeeze %93 : memref<1x128x512xbf16, #tpu.memory_space<any>> -> memref<128x512xbf16, #tpu.memory_space<any>>
      %95 = tpu.memref_slice %arg12[%c0_i32_44] : memref<2x!tpu.dma_semaphore, #tpu.memory_space<semaphore_mem>> -> memref<1x!tpu.dma_semaphore, #tpu.memory_space<semaphore_mem>>
      %96 = tpu.memref_squeeze %95 : memref<1x!tpu.dma_semaphore, #tpu.memory_space<semaphore_mem>> -> memref<!tpu.dma_semaphore, #tpu.memory_space<semaphore_mem>>
      tpu.enqueue_dma source(%94 : memref<128x512xbf16, #tpu.memory_space<any>>) target(%arg10 : memref<128x512xbf16, #tpu.memory_space<vmem>>) target_semaphore(%96 : memref<!tpu.dma_semaphore, #tpu.memory_space<semaphore_mem>>)
      %c1_i32_47 = arith.constant 1 : i32
      %97 = tpu.memref_slice %arg12[%c1_i32_47] : memref<2x!tpu.dma_semaphore, #tpu.memory_space<semaphore_mem>> -> memref<1x!tpu.dma_semaphore, #tpu.memory_space<semaphore_mem>>
      %98 = tpu.memref_squeeze %97 : memref<1x!tpu.dma_semaphore, #tpu.memory_space<semaphore_mem>> -> memref<!tpu.dma_semaphore, #tpu.memory_space<semaphore_mem>>
      tpu.enqueue_dma source(%arg4 : memref<128x128xbf16, #tpu.memory_space<any>>) target(%arg11 : memref<128x128xbf16, #tpu.memory_space<vmem>>) target_semaphore(%98 : memref<!tpu.dma_semaphore, #tpu.memory_space<semaphore_mem>>)
      %c0_i32_48 = arith.constant 0 : i32
      %c0_i32_49 = arith.constant 0 : i32
      %c0_i32_50 = arith.constant 0 : i32
      %99 = tpu.memref_slice %arg3[%arg0, %c0_i32_49, %c0_i32_50] : memref<2x128x512xbf16, #tpu.memory_space<any>> -> memref<1x128x512xbf16, #tpu.memory_space<any>>
      %100 = tpu.memref_squeeze %99 : memref<1x128x512xbf16, #tpu.memory_space<any>> -> memref<128x512xbf16, #tpu.memory_space<any>>
      %101 = tpu.memref_slice %arg12[%c0_i32_48] : memref<2x!tpu.dma_semaphore, #tpu.memory_space<semaphore_mem>> -> memref<1x!tpu.dma_semaphore, #tpu.memory_space<semaphore_mem>>
      %102 = tpu.memref_squeeze %101 : memref<1x!tpu.dma_semaphore, #tpu.memory_space<semaphore_mem>> -> memref<!tpu.dma_semaphore, #tpu.memory_space<semaphore_mem>>
      tpu.wait_dma2 semaphore(%102 : memref<!tpu.dma_semaphore, #tpu.memory_space<semaphore_mem>>) src(%100 : memref<128x512xbf16, #tpu.memory_space<any>>) dst(%arg10 : memref<128x512xbf16, #tpu.memory_space<vmem>>)
      %c1_i32_51 = arith.constant 1 : i32
      %103 = tpu.memref_slice %arg12[%c1_i32_51] : memref<2x!tpu.dma_semaphore, #tpu.memory_space<semaphore_mem>> -> memref<1x!tpu.dma_semaphore, #tpu.memory_space<semaphore_mem>>
      %104 = tpu.memref_squeeze %103 : memref<1x!tpu.dma_semaphore, #tpu.memory_space<semaphore_mem>> -> memref<!tpu.dma_semaphore, #tpu.memory_space<semaphore_mem>>
      tpu.wait_dma2 semaphore(%104 : memref<!tpu.dma_semaphore, #tpu.memory_space<semaphore_mem>>) src(%arg4 : memref<128x128xbf16, #tpu.memory_space<any>>) dst(%arg11 : memref<128x128xbf16, #tpu.memory_space<vmem>>)
    } else {
    }
    %c0 = arith.constant 0 : index
    %c0_1 = arith.constant 0 : index
    %3 = vector.load %arg11[%c0, %c0_1] : memref<128x128xbf16, #tpu.memory_space<vmem>>, vector<128x128xbf16>
    %4 = arith.index_cast %arg1 : i32 to index
    %5 = memref.load %arg2[%4] : memref<2xf32, #tpu.memory_space<smem>>
    %cst = arith.constant 1.000000e+00 : f32
    %6 = arith.addf %cst, %5 : f32
    %c0_2 = arith.constant 0 : index
    %c0_3 = arith.constant 0 : index
    %c0_4 = arith.constant 0 : index
    %7 = vector.load %arg5[%c0_2, %c0_3, %c0_4] : memref<1x128x128xbf16, #tpu.memory_space<vmem>>, vector<1x128x128xbf16>
    %8 = vector.shape_cast %7 : vector<1x128x128xbf16> to vector<128x128xbf16>
    %c0_5 = arith.constant 0 : index
    %c0_6 = arith.constant 0 : index
    %c0_7 = arith.constant 0 : index
    %9 = vector.load %arg6[%c0_5, %c0_6, %c0_7] : memref<1x1x128xf32, #tpu.memory_space<vmem>>, vector<1x1x128xf32>
    %10 = vector.shape_cast %9 : vector<1x1x128xf32> to vector<1x128xf32>
    %c0_8 = arith.constant 0 : index
    %c0_9 = arith.constant 0 : index
    %c0_10 = arith.constant 0 : index
    %11 = vector.load %arg7[%c0_8, %c0_9, %c0_10] : memref<1x128x128xbf16, #tpu.memory_space<vmem>>, vector<1x128x128xbf16>
    %12 = vector.shape_cast %11 : vector<1x128x128xbf16> to vector<128x128xbf16>
    %c0_11 = arith.constant 0 : index
    %c0_12 = arith.constant 0 : index
    %c0_13 = arith.constant 0 : index
    %13 = vector.load %arg8[%c0_11, %c0_12, %c0_13] : memref<1x1x128xf32, #tpu.memory_space<vmem>>, vector<1x1x128xf32>
    %14 = vector.shape_cast %13 : vector<1x1x128xf32> to vector<1x128xf32>
    %c0_14 = arith.constant 0 : index
    %c0_15 = arith.constant 0 : index
    %15 = vector.load %arg10[%c0_14, %c0_15] : memref<128x512xbf16, #tpu.memory_space<vmem>>, vector<128x128xbf16>
    %cst_16 = arith.constant dense<0.000000e+00> : vector<128x128xf32>
    %16 = tpu.matmul %3, %15, %cst_16 {dimension_numbers = #tpu.dot_dimension_numbers<[1], [0], [0], [1], [0, 0, 1, 1], [], []>} : vector<128x128xbf16>, vector<128x128xbf16>, vector<128x128xf32> -> vector<128x128xf32>
    %17 = arith.extf %15 : vector<128x128xbf16> to vector<128x128xf32>
    %18 = vector.broadcast %6 : f32 to vector<128x128xf32>
    %19 = arith.mulf %18, %17 : vector<128x128xf32>
    %20 = arith.addf %19, %16 : vector<128x128xf32>
    %21 = arith.truncf %20 : vector<128x128xf32> to vector<128x128xbf16>
    %cst_17 = arith.constant dense<0.000000e+00> : vector<128x128xf32>
    %22 = tpu.matmul %21, %8, %cst_17 {dimension_numbers = #tpu.dot_dimension_numbers<[1], [0], [0], [1], [0, 0, 1, 1], [], []>} : vector<128x128xbf16>, vector<128x128xbf16>, vector<128x128xf32> -> vector<128x128xf32>
    %23 = vector.broadcast %10 : vector<1x128xf32> to vector<128x128xf32>
    %24 = arith.addf %22, %23 : vector<128x128xf32>
    %cst_18 = arith.constant 0.000000e+00 : f32
    %25 = vector.broadcast %cst_18 : f32 to vector<128x128xf32>
    %26 = arith.maximumf %24, %25 : vector<128x128xf32>
    %27 = arith.truncf %26 : vector<128x128xf32> to vector<128x128xbf16>
    %cst_19 = arith.constant dense<0.000000e+00> : vector<128x128xf32>
    %28 = tpu.matmul %27, %12, %cst_19 {dimension_numbers = #tpu.dot_dimension_numbers<[1], [0], [0], [1], [0, 0, 1, 1], [], []>} : vector<128x128xbf16>, vector<128x128xbf16>, vector<128x128xf32> -> vector<128x128xf32>
    %29 = vector.broadcast %14 : vector<1x128xf32> to vector<128x128xf32>
    %30 = arith.addf %28, %29 : vector<128x128xf32>
    %31 = arith.truncf %30 : vector<128x128xf32> to vector<128x128xbf16>
    %c0_20 = arith.constant 0 : index
    %c0_21 = arith.constant 0 : index
    %32 = vector.load %arg10[%c0_20, %c0_21] : memref<128x512xbf16, #tpu.memory_space<vmem>>, vector<128x128xbf16>
    tpu.vector_store %arg10[%c0_20, %c0_21], %31 {strides = array<i32>} : memref<128x512xbf16, #tpu.memory_space<vmem>>, vector<128x128xbf16>,
    %c0_22 = arith.constant 0 : index
    %c128 = arith.constant 128 : index
    %33 = vector.load %arg10[%c0_22, %c128] : memref<128x512xbf16, #tpu.memory_space<vmem>>, vector<128x128xbf16>
    %cst_23 = arith.constant dense<0.000000e+00> : vector<128x128xf32>
    %34 = tpu.matmul %3, %33, %cst_23 {dimension_numbers = #tpu.dot_dimension_numbers<[1], [0], [0], [1], [0, 0, 1, 1], [], []>} : vector<128x128xbf16>, vector<128x128xbf16>, vector<128x128xf32> -> vector<128x128xf32>
    %35 = arith.extf %33 : vector<128x128xbf16> to vector<128x128xf32>
    %36 = vector.broadcast %6 : f32 to vector<128x128xf32>
    %37 = arith.mulf %36, %35 : vector<128x128xf32>
    %38 = arith.addf %37, %34 : vector<128x128xf32>
    %39 = arith.truncf %38 : vector<128x128xf32> to vector<128x128xbf16>
    %cst_24 = arith.constant dense<0.000000e+00> : vector<128x128xf32>
    %40 = tpu.matmul %39, %8, %cst_24 {dimension_numbers = #tpu.dot_dimension_numbers<[1], [0], [0], [1], [0, 0, 1, 1], [], []>} : vector<128x128xbf16>, vector<128x128xbf16>, vector<128x128xf32> -> vector<128x128xf32>
    %41 = vector.broadcast %10 : vector<1x128xf32> to vector<128x128xf32>
    %42 = arith.addf %40, %41 : vector<128x128xf32>
    %cst_25 = arith.constant 0.000000e+00 : f32
    %43 = vector.broadcast %cst_25 : f32 to vector<128x128xf32>
    %44 = arith.maximumf %42, %43 : vector<128x128xf32>
    %45 = arith.truncf %44 : vector<128x128xf32> to vector<128x128xbf16>
    %cst_26 = arith.constant dense<0.000000e+00> : vector<128x128xf32>
    %46 = tpu.matmul %45, %12, %cst_26 {dimension_numbers = #tpu.dot_dimension_numbers<[1], [0], [0], [1], [0, 0, 1, 1], [], []>} : vector<128x128xbf16>, vector<128x128xbf16>, vector<128x128xf32> -> vector<128x128xf32>
    %47 = vector.broadcast %14 : vector<1x128xf32> to vector<128x128xf32>
    %48 = arith.addf %46, %47 : vector<128x128xf32>
    %49 = arith.truncf %48 : vector<128x128xf32> to vector<128x128xbf16>
    %c0_27 = arith.constant 0 : index
    %c128_28 = arith.constant 128 : index
    %50 = vector.load %arg10[%c0_27, %c128_28] : memref<128x512xbf16, #tpu.memory_space<vmem>>, vector<128x128xbf16>
    tpu.vector_store %arg10[%c0_27, %c128_28], %49 {strides = array<i32>} : memref<128x512xbf16, #tpu.memory_space<vmem>>, vector<128x128xbf16>,
    %51 = arith.addf %30, %48 : vector<128x128xf32>
    %c0_29 = arith.constant 0 : index
    %c256 = arith.constant 256 : index
    %52 = vector.load %arg10[%c0_29, %c256] : memref<128x512xbf16, #tpu.memory_space<vmem>>, vector<128x128xbf16>
    %cst_30 = arith.constant dense<0.000000e+00> : vector<128x128xf32>
    %53 = tpu.matmul %3, %52, %cst_30 {dimension_numbers = #tpu.dot_dimension_numbers<[1], [0], [0], [1], [0, 0, 1, 1], [], []>} : vector<128x128xbf16>, vector<128x128xbf16>, vector<128x128xf32> -> vector<128x128xf32>
    %54 = arith.extf %52 : vector<128x128xbf16> to vector<128x128xf32>
    %55 = vector.broadcast %6 : f32 to vector<128x128xf32>
    %56 = arith.mulf %55, %54 : vector<128x128xf32>
    %57 = arith.addf %56, %53 : vector<128x128xf32>
    %58 = arith.truncf %57 : vector<128x128xf32> to vector<128x128xbf16>
    %cst_31 = arith.constant dense<0.000000e+00> : vector<128x128xf32>
    %59 = tpu.matmul %58, %8, %cst_31 {dimension_numbers = #tpu.dot_dimension_numbers<[1], [0], [0], [1], [0, 0, 1, 1], [], []>} : vector<128x128xbf16>, vector<128x128xbf16>, vector<128x128xf32> -> vector<128x128xf32>
    %60 = vector.broadcast %10 : vector<1x128xf32> to vector<128x128xf32>
    %61 = arith.addf %59, %60 : vector<128x128xf32>
    %cst_32 = arith.constant 0.000000e+00 : f32
    %62 = vector.broadcast %cst_32 : f32 to vector<128x128xf32>
    %63 = arith.maximumf %61, %62 : vector<128x128xf32>
    %64 = arith.truncf %63 : vector<128x128xf32> to vector<128x128xbf16>
    %cst_33 = arith.constant dense<0.000000e+00> : vector<128x128xf32>
    %65 = tpu.matmul %64, %12, %cst_33 {dimension_numbers = #tpu.dot_dimension_numbers<[1], [0], [0], [1], [0, 0, 1, 1], [], []>} : vector<128x128xbf16>, vector<128x128xbf16>, vector<128x128xf32> -> vector<128x128xf32>
    %66 = vector.broadcast %14 : vector<1x128xf32> to vector<128x128xf32>
    %67 = arith.addf %65, %66 : vector<128x128xf32>
    %68 = arith.truncf %67 : vector<128x128xf32> to vector<128x128xbf16>
    %c0_34 = arith.constant 0 : index
    %c256_35 = arith.constant 256 : index
    %69 = vector.load %arg10[%c0_34, %c256_35] : memref<128x512xbf16, #tpu.memory_space<vmem>>, vector<128x128xbf16>
    tpu.vector_store %arg10[%c0_34, %c256_35], %68 {strides = array<i32>} : memref<128x512xbf16, #tpu.memory_space<vmem>>, vector<128x128xbf16>,
    %70 = arith.addf %51, %67 : vector<128x128xf32>
    %c0_36 = arith.constant 0 : index
    %c384 = arith.constant 384 : index
    %71 = vector.load %arg10[%c0_36, %c384] : memref<128x512xbf16, #tpu.memory_space<vmem>>, vector<128x128xbf16>
    %cst_37 = arith.constant dense<0.000000e+00> : vector<128x128xf32>
    %72 = tpu.matmul %3, %71, %cst_37 {dimension_numbers = #tpu.dot_dimension_numbers<[1], [0], [0], [1], [0, 0, 1, 1], [], []>} : vector<128x128xbf16>, vector<128x128xbf16>, vector<128x128xf32> -> vector<128x128xf32>
    %73 = arith.extf %71 : vector<128x128xbf16> to vector<128x128xf32>
    %74 = vector.broadcast %6 : f32 to vector<128x128xf32>
    %75 = arith.mulf %74, %73 : vector<128x128xf32>
    %76 = arith.addf %75, %72 : vector<128x128xf32>
    %77 = arith.truncf %76 : vector<128x128xf32> to vector<128x128xbf16>
    %cst_38 = arith.constant dense<0.000000e+00> : vector<128x128xf32>
    %78 = tpu.matmul %77, %8, %cst_38 {dimension_numbers = #tpu.dot_dimension_numbers<[1], [0], [0], [1], [0, 0, 1, 1], [], []>} : vector<128x128xbf16>, vector<128x128xbf16>, vector<128x128xf32> -> vector<128x128xf32>
    %79 = vector.broadcast %10 : vector<1x128xf32> to vector<128x128xf32>
    %80 = arith.addf %78, %79 : vector<128x128xf32>
    %cst_39 = arith.constant 0.000000e+00 : f32
    %81 = vector.broadcast %cst_39 : f32 to vector<128x128xf32>
    %82 = arith.maximumf %80, %81 : vector<128x128xf32>
    %83 = arith.truncf %82 : vector<128x128xf32> to vector<128x128xbf16>
    %cst_40 = arith.constant dense<0.000000e+00> : vector<128x128xf32>
    %84 = tpu.matmul %83, %12, %cst_40 {dimension_numbers = #tpu.dot_dimension_numbers<[1], [0], [0], [1], [0, 0, 1, 1], [], []>} : vector<128x128xbf16>, vector<128x128xbf16>, vector<128x128xf32> -> vector<128x128xf32>
    %85 = vector.broadcast %14 : vector<1x128xf32> to vector<128x128xf32>
    %86 = arith.addf %84, %85 : vector<128x128xf32>
    %87 = arith.truncf %86 : vector<128x128xf32> to vector<128x128xbf16>
    %c0_41 = arith.constant 0 : index
    %c384_42 = arith.constant 384 : index
    %88 = vector.load %arg10[%c0_41, %c384_42] : memref<128x512xbf16, #tpu.memory_space<vmem>>, vector<128x128xbf16>
    tpu.vector_store %arg10[%c0_41, %c384_42], %87 {strides = array<i32>} : memref<128x512xbf16, #tpu.memory_space<vmem>>, vector<128x128xbf16>,
    %89 = arith.addf %70, %86 : vector<128x128xf32>
    %c1_i32 = arith.constant 1 : i32
    %90 = arith.cmpi eq, %arg1, %c1_i32 : i32
    %91 = arith.extui %90 : i1 to i32
    %c0_i32_43 = arith.constant 0 : i32
    %92 = arith.cmpi ne, %91, %c0_i32_43 : i32
    scf.if %92 {
      %c0_44 = arith.constant 0 : index
      %c0_45 = arith.constant 0 : index
      %c0_46 = arith.constant 0 : index
      %93 = vector.load %arg9[%c0_44, %c0_45, %c0_46] : memref<1x128x128xf32, #tpu.memory_space<vmem>>, vector<1x128x128xf32>
      %94 = vector.shape_cast %93 : vector<1x128x128xf32> to vector<128x128xf32>
      %95 = vector.shape_cast %89 : vector<128x128xf32> to vector<1x128x128xf32>
      tpu.vector_store %arg9[%c0_44, %c0_45, %c0_46], %95 {strides = array<i32>} : memref<1x128x128xf32, #tpu.memory_space<vmem>>, vector<1x128x128xf32>,
    } else {
    }
    return
  }
  func.func @transform_0(%arg0: i32, %arg1: i32) -> i32 {
    %c0_i32 = arith.constant 0 : i32
    %c0_i32_0 = arith.constant 0 : i32
    return %c0_i32 : i32
  }
  func.func @transform_3(%arg0: i32, %arg1: i32) -> (i32, i32, i32) {
    %c0_i32 = arith.constant 0 : i32
    %c0_i32_0 = arith.constant 0 : i32
    %c0_i32_1 = arith.constant 0 : i32
    return %arg1, %c0_i32, %c0_i32_0 : i32, i32, i32
  }
  func.func @transform_4(%arg0: i32, %arg1: i32) -> (i32, i32, i32) {
    %c0_i32 = arith.constant 0 : i32
    %c0_i32_0 = arith.constant 0 : i32
    %c0_i32_1 = arith.constant 0 : i32
    return %arg1, %c0_i32, %c0_i32_0 : i32, i32, i32
  }
  func.func @transform_5(%arg0: i32, %arg1: i32) -> (i32, i32, i32) {
    %c0_i32 = arith.constant 0 : i32
    %c0_i32_0 = arith.constant 0 : i32
    %c0_i32_1 = arith.constant 0 : i32
    return %arg1, %c0_i32, %c0_i32_0 : i32, i32, i32
  }
  func.func @transform_6(%arg0: i32, %arg1: i32) -> (i32, i32, i32) {
    %c0_i32 = arith.constant 0 : i32
    %c0_i32_0 = arith.constant 0 : i32
    %c0_i32_1 = arith.constant 0 : i32
    return %arg1, %c0_i32, %c0_i32_0 : i32, i32, i32
  }
  func.func @transform_7(%arg0: i32, %arg1: i32) -> (i32, i32, i32) {
    %c0_i32 = arith.constant 0 : i32
    %c0_i32_0 = arith.constant 0 : i32
    %c0_i32_1 = arith.constant 0 : i32
    return %arg0, %c0_i32, %c0_i32_0 : i32, i32, i32
  }
}

</mosaic_0001>

<bundles_post_ra>
// kernel: tpu_custom_call.1
= control target key start
LH: loop header
LB: loop body
LE: loop exit
PB: predicated region body
PF: predicated region fallthrough
CT: control target
= control target key end

     0   :  { %s4697_s0 = inlined_call_operand.hbm [shape: f32[2], index: 0, kind: input, shape index: {}]   ;;  %s4698_s1 = inlined_call_operand.hbm [shape: bf16[2,128,512], index: 1, kind: input, shape index: {}]   ;;  %s4699_s2 = inlined_call_operand.hbm [shape: bf16[128,128], index: 2, kind: input, shape index: {}]   ;;  %s4700_s3 = inlined_call_operand.hbm [shape: bf16[2,128,128], index: 3, kind: input, shape index: {}]   ;;  %s4701_s4 = inlined_call_operand.vmem [shape: f32[2,1,128], index: 4, kind: input, shape index: {}]   ;;  %s4702_s5 = inlined_call_operand.hbm [shape: bf16[2,128,128], index: 5, kind: input, shape index: {}]   ;;  %s4703_s6 = inlined_call_operand.vmem [shape: f32[2,1,128], index: 6, kind: input, shape index: {}]   ;;  %s4704_s7 = inlined_call_operand.hbm [shape: f32[2,128,128], index: 7, kind: output, shape index: {}]  }
   0x1   :  { %4728 = sst [smem:[#allocation39_spill]] %s4697_s0 }
   0x2   :  { %4729 = sst [smem:[#allocation40_spill]] %s4698_s1 }
   0x3   :  { %4730 = sst [smem:[#allocation41_spill]] %s4699_s2 }
   0x4   :  { %4731 = sst [smem:[#allocation42_spill]] %s4700_s3 }
   0x5   :  { %4732 = sst [smem:[#allocation43_spill]] %s4701_s4 }
   0x6   :  { %4733 = sst [smem:[#allocation44_spill]] %s4702_s5 }
   0x7   :  { %4734 = sst [smem:[#allocation45_spill]] %s4704_s7 }
   0x8   :  { %12 = vsyncpa [#allocation8], 0 }
   0x9   :  { %13 = vsyncpa [#allocation6], 0 }
   0xa   :  { %15 = vsyncpa [#allocation6 + $0x1], 0 }
   0xb   :  { %16 = vsyncpa [#allocation11], 0 }
   0xc   :  { %18 = vsyncpa [#allocation11 + $0x1], 0 }
   0xd   :  { %19 = vsyncpa [#allocation7], 0 }
   0xe   :  { %21 = vsyncpa [#allocation7 + $0x1], 0  ;;  %s3478_s24 = smov 0   ;;  %s3480_s25 = smov 0  }
   0xf   :  { %s3482_s26 = smov 0   ;;  %s3484_s27 = smov 0  }
  0x10   :  { %s3486_s28 = smov 0   ;;  %s3488_s29 = smov 0  }
  0x11   :  { %s3490_s30 = smov 0   ;;  %s3492_s8 = smov 0  }
  0x12   :  { %s3494_s9 = smov 0   ;;  %s3496_s10 = smov 0  }
  0x13   :  { %s3498_s11 = smov 0  }
  0x14 LB: > { %4735 = sst [smem:[#allocation26_spill]] %s3378_s24  ;;  %s2366_s12 = sadd.s32 4294967295, %s3418_s11   ;;  %s3418_s11 = sphi %s3498_s11, %s27_s11   ;;  %s3414_s10 = sphi %s3496_s10, %s4784_s10   ;;  %s3410_s9 = sphi %s3494_s9, %s4792_s9   ;;  %s3406_s8 = sphi %s3492_s8, %s4782_s8   ;;  %s3402_s30 = sphi %s3490_s30, %s4791_s30   ;;  %s3398_s29 = sphi %s3488_s29, %s4790_s29   ;;  %s3394_s28 = sphi %s3486_s28, %s4789_s28   ;;  %s3390_s27 = sphi %s3484_s27, %s4788_s27   ;;  %s3386_s26 = sphi %s3482_s26, %s4787_s26   ;;  %s3382_s25 = sphi %s3480_s25, %s4786_s25   ;;  %s3378_s24 = sphi %s3478_s24, %s4785_s24  }
  0x15   : > { %4736 = sst [smem:[#allocation27_spill]] %s3414_s10  ;;  %s2367_s13 = sadd.s32 4294967294, %s3418_s11  }
  0x16   : > { %4737 = sst [smem:[#allocation28_spill]] %s3418_s11  ;;  %p74_p0 = scmp.ne.s32.totalorder %s3398_s29, %s3394_s28 }
  0x17   : > { %p75_p1 = scmp.eq.s32.totalorder %s3418_s11, 0  ;;  %p80_p2 = scmp.ne.s32.totalorder %s3394_s28, %s3390_s27 }
  0x18   : > { %p3538_p3 = scmp.eq.s32.totalorder %s2366_s12, 0  ;;  %p181_p5 = scmp.ne.s32.totalorder %s3386_s26, %s3382_s25 }
  0x19   : > { %p3543_p4 = por %p75_p1, %p74_p0  ;;  %p182_p7 = scmp.eq.s32.totalorder %s2366_s12, 3 }
  0x1a   : > { %s4738_s15 = scalar_select %p3538_p3, 1, 0 }
  0x1b   : > { %p3551_p6 = por %p3538_p3, %p80_p2  ;;  %p187_p8 = scmp.ne.s32.totalorder %s3382_s25, %s3378_s24 }
  0x1c   : > { %p188_p9 = scmp.eq.s32.totalorder %s2367_s13, 3  ;;  %p3557_p10 = por %p182_p7, %p181_p5 }
  0x1d   : > { %s4740_s18 = scalar_select %p3551_p6, 1, 0 }
  0x1e   : > { %s4741_s19 = scalar_select %p3557_p10, 1, 0 }
  0x1f   : > { %p2368_p11 = scmp.ge.s32.totalorder %s3418_s11, 1  ;;  %p3562_p12 = por %p188_p9, %p187_p8 }
  0x20   : > { %4742 = sst [smem:[#allocation29_spill]] %s4741_s19  ;;  %p195_p13 = scmp.lt.s32.totalorder %s3418_s11, 5 }
  0x21   : > { %s4743_s20 = scalar_select %p3562_p12, 1, 0 }
  0x22   : > { %p3567_p0 = pnand %p2368_p11, %p195_p13  ;;  %p3034_p1 = scmp.lt.s32.totalorder %s3418_s11, 4 }
  0x23   : > { %4744 = sst [smem:[#allocation30_spill]] %s4743_s20  ;;  %s36_s23 = sadd.s32 1, %s3410_s9 }
  0x24   : > { %p3018_p2 = pneg %p3567_p0  ;;  %p3576_p6 = pnand %p3034_p1, %p3543_p4 }
  0x25   : > { %p3583_p7 = scmp.ge.s32.totalorder %s36_s23, 2  ;;  %s4748_s0 = sld [smem:[#allocation39_spill]] }
  0x26   : > { %p3019_p5 = pnand %p3018_p2, %p3538_p3 }
  0x28   : > { %p3183_p9 = pneg %p3019_p5 }
  0x2b   : > { %s3181_s16 = scalar_lea.hbm %s4748_s0, 16 }
  0x2c   : > { %p3182_p8 = scmp.ne.s32.totalorder %s4748_s0, %s3181_s16  ;;  %p3188_p13 = scmp.lt.u32.totalorder %s3181_s16, %s4748_s0 }
  0x2e   : > { %p3184_p4 = pnand %p3183_p9, %p3182_p8 }
  0x30   : > { %p3185_p11 = pneg %p3184_p4 }
  0x32   : > { %p3190_p1 = pnand %p3188_p13, %p3185_p11 }
  0x34   : > { %3193 = shalt.err (!%p3190_p1)
}
  0x35   : > { %s3420_s11 = smov [#allocation5]   ;;  %s4794_s23 = smov (%p3583_p7, %s36_s23), 0 }
  0x36   : > { %3021 = dma.hbm_to_smem (!%p3019_p5), %s4748_s0, 16, %s3420_s11, [#allocation8]  }
  0x37   : > { %4749 = sst [smem:[#allocation31_spill]] %s4794_s23  ;;  %s39_s24 = sadd.s32 1, %s3414_s10 }
  0x38   : > { %s3605_s7 = sand.u32 1, %s3398_s29   ;;  %s4796_s24 = smov (!%p3583_p7, %s39_s24), %s3414_s10 }
  0x39   : > { %s64_s14 = ssub.s32 %s3410_s9, %s4794_s23  ;;  %p41_p2 = scmp.ge.s32.totalorder %s4796_s24, 2 }
  0x3a   : > { %p65_p8 = scmp.eq.s32.totalorder %s64_s14, 0  ;;  %s4716_s11 = sshll.u32 %s3605_s7, 6 }
  0x3b   : > { %s4715_s16 = sshll.u32 %s3410_s9, 10  ;;  %s4798_s24 = smov (%p41_p2, %s4796_s24), 0 }
  0x3c   : > { %4750 = sst [smem:[#allocation32_spill]] %s4798_s24  ;;  %s4751_s19 = sadd.s32 1, %s3398_s29 }
  0x3d   : > { %s3619_s20 = scalar_select %p65_p8, %s3398_s29, %s4751_s19  }
  0x3e   : > { %s168_s12 = ssub.s32 %s3414_s10, %s4798_s24  ;;  %s4753_s3 = sld [smem:[#allocation42_spill]] }
  0x3f   : > { %4752 = sst [smem:[#allocation33_spill]] %s3619_s20  ;;  %p169_p5 = scmp.eq.s32.totalorder %s168_s12, 0 }
  0x40   : > { %s221_s14 = scalar_lea.vmem [#allocation9], %s4716_s11  ;;  %s4754_s23 = sadd.s32 1, %s3386_s26 }
  0x41   : > { %s228_s0 = sshll.u32 %s221_s14, 4  ;;  %s218_s19 = scalar_lea.sflag [#allocation6], %s3605_s7  ;;  %s3637_s0 = int_to_ptr.vmem [resolvable:$true] %s228_s0 }
  0x42   : > { %s3635_s2 = scalar_select %p169_p5, %s3386_s26, %s4754_s23  }
  0x43   : > { %p3196_p9 = pneg %p3576_p6 }
  0x44   : > { %s3628_s17 = scalar_lea.hbm %s4753_s3, %s4715_s16  ;;  %s3199_s16 = scalar_lea.hbm %s4753_s3, 2048 }
  0x45   : > { %s3194_s12 = scalar_lea.hbm %s3628_s17, 1024  ;;  %p3200_p13 = scmp.lt.u32.totalorder %s3628_s17, %s4753_s3 }
  0x46   : > { %p3195_p7 = scmp.ne.s32.totalorder %s3628_s17, %s3194_s12  ;;  %p3201_p1 = scmp.lt.u32.totalorder %s3199_s16, %s3194_s12 }
  0x47   : > { %p3203_p8 = scmp.lt.u32.totalorder %s3194_s12, %s3628_s17 }
  0x48   : > { %p3197_p4 = pnand %p3196_p9, %p3195_p7  ;;  %p3202_p2 = por %p3201_p1, %p3200_p13 }
  0x4a   : > { %p3198_p11 = pneg %p3197_p4  ;;  %p3204_p5 = por %p3203_p8, %p3202_p2 }
  0x4c   : > { %p3205_p12 = pnand %p3204_p5, %p3198_p11 }
  0x4e   : > { %3208 = shalt.err (!%p3205_p12)
}
  0x4f   : > { %s3209_s23 = scalar_lea.vmem %s3637_s0, 1024  ;;  %s3421_s27 = smov [#allocation9]  }
  0x50   : > { %p3210_p7 = scmp.ne.s32.totalorder %s3637_s0, %s3209_s23  ;;  %s3214_s13 = sshll.u32 %s3421_s27, 4  ;;  %s3215_s13 = int_to_ptr.vmem [resolvable:$false] %s3214_s13 }
  0x51   : > { %s3216_s11 = scalar_lea.vmem %s3215_s13, 2048  ;;  %p3217_p3 = scmp.lt.s32.totalorder %s3637_s0, %s3215_s13 }
  0x52   : > { %p3212_p4 = pnand %p3210_p7, %p3196_p9  ;;  %p3218_p13 = scmp.lt.s32.totalorder %s3216_s11, %s3209_s23 }
  0x54   : > { %p3213_p10 = pneg %p3212_p4  ;;  %p3219_p1 = por %p3218_p13, %p3217_p3 }
  0x56   : > { %p3220_p2 = pnand %p3219_p1, %p3213_p10 }
  0x58   : > { %3223 = shalt.err (!%p3220_p2)
}
  0x59   : > { %s3422_s16 = smov 64   ;;  %s3423_s12 = smov 4  }
  0x5a   : > { %3025 = dma.hbm_to_vmem [thread:$0]  (!%p3576_p6), %s3628_s17, 1024, %s3637_s0, %s218_s19, %s3422_s16, %s3422_s16, %s3423_s12  }
  0x5b   : > { %s4755_s14 = sshll.u32 %s3410_s9, 10  ;;  %s4756_s5 = sld [smem:[#allocation44_spill]] }
  0x5c   : > { %s4757_s11 = sshll.u32 %s3605_s7, 6  ;;  %s245_s10 = scalar_lea.sflag [#allocation11], %s3605_s7 }
  0x5d   : > { %s248_s3 = scalar_lea.vmem [#allocation10], %s4757_s11 }
  0x5e   : > { %s255_s24 = sshll.u32 %s248_s3, 4  ;;  %s3679_s24 = int_to_ptr.vmem [resolvable:$true] %s255_s24 }
  0x61   : > { %s3675_s13 = scalar_lea.hbm %s4756_s5, %s4755_s14  ;;  %s3229_s19 = scalar_lea.hbm %s4756_s5, 2048 }
  0x62   : > { %s3224_s20 = scalar_lea.hbm %s3675_s13, 1024  ;;  %p3230_p11 = scmp.lt.u32.totalorder %s3675_s13, %s4756_s5 }
  0x63   : > { %p3225_p3 = scmp.ne.s32.totalorder %s3675_s13, %s3224_s20  ;;  %p3231_p8 = scmp.lt.u32.totalorder %s3229_s19, %s3224_s20 }
  0x64   : > { %p3233_p7 = scmp.lt.u32.totalorder %s3224_s20, %s3675_s13 }
  0x65   : > { %p3227_p10 = pnand %p3225_p3, %p3196_p9  ;;  %p3232_p5 = por %p3231_p8, %p3230_p11 }
  0x67   : > { %p3228_p12 = pneg %p3227_p10  ;;  %p3234_p4 = por %p3233_p7, %p3232_p5 }
  0x69   : > { %p3235_p13 = pnand %p3234_p4, %p3228_p12 }
  0x6b   : > { %3238 = shalt.err (!%p3235_p13)
}
  0x6c   : > { %s3239_s3 = scalar_lea.vmem %s3679_s24, 1024  ;;  %s3424_s27 = smov [#allocation10]  }
  0x6d   : > { %p3240_p1 = scmp.ne.s32.totalorder %s3679_s24, %s3239_s3  ;;  %s3244_s11 = sshll.u32 %s3424_s27, 4  ;;  %s3245_s11 = int_to_ptr.vmem [resolvable:$false] %s3244_s11 }
  0x6e   : > { %s3246_s0 = scalar_lea.vmem %s3245_s11, 2048  ;;  %p3247_p10 = scmp.lt.s32.totalorder %s3679_s24, %s3245_s11 }
  0x6f   : > { %p3242_p2 = pnand %p3240_p1, %p3196_p9  ;;  %p3248_p11 = scmp.lt.s32.totalorder %s3246_s0, %s3239_s3 }
  0x71   : > { %p3243_p3 = pneg %p3242_p2  ;;  %p3249_p8 = por %p3248_p11, %p3247_p10 }
  0x73   : > { %p3250_p5 = pnand %p3249_p8, %p3243_p3 }
  0x75   : > { %3253 = shalt.err (!%p3250_p5)
}
  0x76   : > { %3028 = dma.hbm_to_vmem [thread:$0]  (!%p3576_p6), %s3675_s13, 1024, %s3679_s24, %s245_s10, %s3422_s16, %s3422_s16, %s3423_s12  }
  0x77   : > { %273 = sbr.rel (%p3567_p0) target bundleno = 1701 (0x6a5), region = 40 }
  0x7e   : > { %p4758_p9 = scmp.ne.s32.totalorder %s4738_s15, 0 }
  0x80   : > { %3353 = dma.done.wait (%p4758_p9), [#allocation8], 16  }
  0x81   : > { %3355 = vsyncadd (%p4758_p9), [#allocation8], 4294967280  ;;  %s279_s22 = sand.u32 1, %s3394_s28   ;;  %p4759_p12 = scmp.ne.s32.totalorder %s4740_s18, 0 }
  0x82   : > { %s2379_s20 = sshll.u32 %s279_s22, 6  ;;  %s280_s17 = scalar_lea.sflag [#allocation6], %s279_s22 }
  0x83   : > { %s3717_s19 = scalar_lea.vmem [#allocation9], %s2379_s20 }
  0x84   : > { %3357 = dma.done.wait (%p4759_p12), %s280_s17, 1024  }
  0x85   : > { %3359 = vsyncadd (%p4759_p12), %s280_s17, 4294966272  ;;  %s289_s10 = scalar_lea.sflag [#allocation11], %s279_s22  ;;  %s3723_s21 = scalar_lea.vmem [#allocation10], %s2379_s20 }
  0x86   : > { %3361 = dma.done.wait (%p4759_p12), %s289_s10, 1024  }
  0x87   : > { %3363 = vsyncadd (%p4759_p12), %s289_s10, 4294966272 }
  0x88   : > { %297 = sfence }
  0x89   : > { %s4722_s15 = sand.u32 1, %s3382_s25   ;;  %p331_p6 = scmp.lt.s32.totalorder %s3402_s30, 1 }
  0x8a   : > { %s2381_s24 = sshll.u32 %s4722_s15, 7  ;;  %p3036_p0 = scmp.eq.s32.totalorder %s3402_s30, 0 }
  0x8b   : > { %s332_s7 = scalar_select %p331_p6, %s3402_s30, 1 }
  0x8c   : > { %s4760_s4 = sld [smem:[#allocation43_spill]]  ;;  %s3745_s3 = scalar_lea.vmem [#allocation12], %s2381_s24 }
  0x8d   : > { %s3743_s23 = scalar_lea.vmem %s4703_s6, %s332_s7 }
  0x92   : > { %s3738_s13 = scalar_lea.vmem %s4760_s4, %s332_s7 }
  0x93   : > { %s2415_s27 = sshll.u32 %s3406_s8, 12  ;;  %s4761_s1 = sld [smem:[#allocation40_spill]] }
  0x94   : > { %s3425_s20 = smov [#allocation2]   ;;  %s3426_s7 = smov 512  }
  0x95   : > { %s357_s17 = sshll.u32 %s3425_s20, 4  ;;  %3003 = sst [smem:[#allocation14]] (%p3036_p0), %s3426_s7  ;;  %s358_s17 = int_to_ptr.vmem [resolvable:$true] %s357_s17 }
  0x96   : > { %s3002_s10 = scalar_select %p3036_p0, [#allocation0], [#allocation19] }
  0x97   : > { %3004 = sst [smem:[#allocation14 + $0x1]] (%p3036_p0), %s3426_s7  ;;  %s3427_s16 = smov 4  }
  0x98   : > { %s349_s24 = sld [smem:[%s3002_s10]]   ;;  %s3428_s12 = smov 64  }
  0x99   : > { %s344_s22 = scalar_lea.hbm %s4761_s1, %s2415_s27  ;;  %3005 = sst [smem:[#allocation14 + $0x2]] (%p3036_p0), %s3427_s16 }
  0x9a   : > { %3006 = sst [smem:[#allocation14 + $0x3]] (%p3036_p0), %s3428_s12  ;;  %s3429_s14 = smov 128  }
  0x9b   : > { %3007 = sst [smem:[#allocation14 + $0x4]] (%p3036_p0), %s3429_s14  ;;  %s3430_s18 = smov 2  }
  0x9c   : > { %3008 = sst [smem:[#allocation14 + $0x5]] (%p3036_p0), %s3430_s18  ;;  %s3431_s11 = smov 256  }
  0x9d   : > { %3009 = sst [smem:[#allocation14 + $0x6]] (%p3036_p0), %s3431_s11  ;;  %s3432_s20 = smov [#allocation4]  }
  0x9e   : > { %s2385_s27 = sshll.u32 %s349_s24, 26  ;;  %3010 = sst [smem:[#allocation14 + $0x7]] (%p3036_p0), %s3428_s12 }
  0x9f   : > { %s2386_s0 = sadd.s32 134217728, %s2385_s27  ;;  %3011 = sst [smem:[#allocation14 + $0x8]] (%p3036_p0), %s3427_s16 }
  0xa0   : > { %s3433_s10 = smov [#allocation13]   ;;  %s3434_s7 = smov [#allocation3]  }
  0xa1   : > { %3012 = dma.general (%p3036_p0), %s344_s22, 4096, %s358_s17, %s3432_s20, %s3433_s10, [#allocation14], %s2386_s0, 0  }
  0xa2   : > { %s388_s15 = sshll.u32 %s3434_s7, 4  ;;  %s4762_s4 = sld [smem:[#allocation41_spill]]  ;;  %s389_s15 = int_to_ptr.vmem [resolvable:$true] %s388_s15 }
  0xa8   : > { %s3254_s18 = scalar_lea.hbm %s4762_s4, 1024 }
  0xa9   : > { %p3255_p7 = scmp.ne.s32.totalorder %s4762_s4, %s3254_s18  ;;  %p3260_p1 = scmp.lt.u32.totalorder %s3254_s18, %s4762_s4 }
  0xab   : > { %p3256_p4 = pnand %p3255_p7, %p3036_p0 }
  0xad   : > { %p3257_p13 = pneg %p3256_p4 }
  0xaf   : > { %p3262_p2 = pnand %p3260_p1, %p3257_p13 }
  0xb1   : > { %3265 = shalt.err (!%p3262_p2)  }
  0xb2   : > { %s3266_s22 = scalar_lea.vmem %s389_s15, 1024  ;;  %p3273_p8 = scmp.lt.s32.totalorder %s389_s15, %s389_s15 }
  0xb3   : > { %p3267_p3 = scmp.ne.s32.totalorder %s389_s15, %s3266_s22  ;;  %p3274_p5 = scmp.lt.s32.totalorder %s3266_s22, %s3266_s22 }
  0xb5   : > { %p3268_p10 = pnand %p3267_p3, %p3036_p0  ;;  %p3275_p9 = por %p3274_p5, %p3273_p8 }
  0xb7   : > { %p3269_p11 = pneg %p3268_p10 }
  0xb9   : > { %p3276_p12 = pnand %p3275_p9, %p3269_p11 }
  0xbb   : > { %3279 = shalt.err (!%p3276_p12)  }
  0xbc   : > { %3013 = dma.hbm_to_vmem [thread:$0]  (%p3036_p0), %s4762_s4, 1024, %s389_s15, [#allocation4 + $0x1] }
  0xbd   : > { %3365 = dma.done.wait (%p3036_p0), [#allocation4], 4096 }
  0xbe   : > { %3367 = vsyncadd (%p3036_p0), [#allocation4], 4294963200 }
  0xbf   : > { %3369 = dma.done.wait (%p3036_p0), [#allocation4 + $0x1], 1024 }
  0xc0   : > { %3371 = vsyncadd (%p3036_p0), [#allocation4 + $0x1], 4294966272  ;;  %v3799_v0 = vld [vmem:[#allocation2] sm:$0xff]  ;;  %v3817_v5 = vld [vmem:[%s3717_s19 + $0x8] sm:$0xff]   ;;  %s407_s15 = sld [smem:[#allocation5 + %s3402_s30]]  ;;  %p2405_p6 = scmp.ne.s32.totalorder %s3402_s30, 1 }
  0xc1   : > { %v3801_v1 = vld [vmem:[#allocation2 + $0x20] sm:$0xff]  ;;  %2609 = vmatprep.subr.bf16.mxu0 %v3799_v0  ;;  %v3826_v7 = vld [vmem:[%s3717_s19 + $0x10] sm:$0xff]   ;;  %v3832_v9 = vld [vmem:[%s3717_s19 + $0x18] sm:$0xff]   ;;  %v548_v34 = vunpack.c.l.bf16 %v3799_v0  ;;  %v549_v35 = vunpack.c.h.bf16 %v3799_v0 }
  0xc2   : > { %2610 = vmatpush3.bf16.msra.mxu0 %v3799_v0  ;;  %v3805_v2 = vld [vmem:[#allocation3] sm:$0xff]  ;;  %v3853_v13 = vld [vmem:[%s3717_s19 + $0x28] sm:$0xff]   ;;  %v3866_v16 = vld [vmem:[#allocation3 + $0x10] sm:$0xff]  ;;  %v550_v31 = vunpack.c.l.bf16 %v3801_v1  ;;  %v551_v32 = vunpack.c.h.bf16 %v3801_v1 }
  0xc3   : > { %2611 = vmatprep.subr.bf16.mxu0 %v3801_v1  ;;  %2625 = vmatprep.mubr.bf16.mxu0 %v3805_v2  ;;  %v3809_v3 = vld [vmem:[#allocation2 + $0x40] sm:$0xff]  ;;  %v3864_v15 = vld [vmem:[#allocation3 + $0x8] sm:$0xff]  ;;  %v3870_v17 = vld [vmem:[#allocation3 + $0x18] sm:$0xff] }
  0xc4   : > { %v3813_v4 = vld [vmem:[%s3717_s19] sm:$0xff]   ;;  %v3876_v19 = vld [vmem:[#allocation3 + $0x28] sm:$0xff]  ;;  %v3878_v20 = vld [vmem:[#allocation3 + $0x30] sm:$0xff]  ;;  %v552_v50 = vunpack.c.l.bf16 %v3809_v3  ;;  %v553_v51 = vunpack.c.h.bf16 %v3809_v3 }
  0xc5   : > { %v3819_v6 = vld [vmem:[#allocation2 + $0x60] sm:$0xff]  ;;  %2641 = vmatprep.subr.bf16.mxu1 %v3813_v4  ;;  %v3882_v21 = vld [vmem:[#allocation3 + $0x38] sm:$0xff]  ;;  %v3886_v22 = vld [vmem:[%s3717_s19 + $0x30] sm:$0xff]  }
  0xc6   : > { %2612 = vmatpush3.bf16.msra.mxu0 %v3801_v1  ;;  %2642 = vmatpush3.bf16.msra.mxu1 %v3813_v4  ;;  %v3829_v8 = vld [vmem:[#allocation2 + $0x80] sm:$0xff]  ;;  %v3891_v23 = vld [vmem:[%s3717_s19 + $0x38] sm:$0xff]   ;;  %v3895_v24 = vld [vmem:[#allocation2 + $0x8] sm:$0xff]  ;;  %s408_s17 = sadd.f32 1.0, %s407_s15  ;;  %v554_v46 = vunpack.c.l.bf16 %v3819_v6  ;;  %v555_v47 = vunpack.c.h.bf16 %v3819_v6 }
  0xc7   : > { %2613 = vmatprep.subr.bf16.mxu0 %v3809_v3  ;;  %2643 = vmatprep.subr.bf16.mxu1 %v3817_v5  ;;  %v3836_v10 = vld [vmem:[#allocation2 + $0xa0] sm:$0xff]  ;;  %v3902_v26 = vld [vmem:[%s3723_s21 + $0x8] sm:$0xff]   ;;  %v3908_v27 = vld [vmem:[%s3723_s21 + $0x10] sm:$0xff]  }
  0xc8   : > { %v3844_v11 = vld [vmem:[%s3717_s19 + $0x20] sm:$0xff]   ;;  %v3913_v28 = vld [vmem:[%s3723_s21 + $0x18] sm:$0xff]   ;;  %v3923_v30 = vld [vmem:[%s3723_s21 + $0x28] sm:$0xff]   ;;  %v3931_v33 = vstv %s408_s17  ;;  %v558_v1 = vunpack.c.l.bf16 %v3836_v10 }
  0xc9   : > { %v3847_v12 = vld [vmem:[#allocation2 + $0xc0] sm:$0xff]  ;;  %v567_v36 = vmul.f32 %v3931_v33, %v550_v31  ;;  %v568_v37 = vmul.f32 %v3931_v33, %v551_v32  ;;  %v565_v39 = vmul.f32 %v3931_v33, %v548_v34  ;;  %v566_v40 = vmul.f32 %v3931_v33, %v549_v35  ;;  %v3947_v59 = vld [vmem:[#allocation2 + $0x28] sm:$0xff] }
  0xca   : > { %2614 = vmatpush3.bf16.msra.mxu0 %v3809_v3  ;;  %2644 = vmatpush3.bf16.msra.mxu1 %v3817_v5  ;;  %v3856_v14 = vld [vmem:[#allocation2 + $0xe0] sm:$0xff]  ;;  %v571_v54 = vmul.f32 %v3931_v33, %v554_v46  ;;  %v572_v55 = vmul.f32 %v3931_v33, %v555_v47  ;;  %v569_v57 = vmul.f32 %v3931_v33, %v552_v50  ;;  %v559_v3 = vunpack.c.h.bf16 %v3836_v10  ;;  %v3954_v34 = vld [vmem:[#allocation2 + $0x48] sm:$0xff] }
  0xcb   : > { %2615 = vmatprep.subr.bf16.mxu0 %v3819_v6  ;;  %2645 = vmatprep.subr.bf16.mxu1 %v3826_v7  ;;  %v3872_v18 = vld [vmem:[#allocation3 + $0x20] sm:$0xff]  ;;  %v570_v58 = vmul.f32 %v3931_v33, %v553_v51  ;;  %v556_v32 = vunpack.c.l.bf16 %v3829_v8  ;;  %v557_v35 = vunpack.c.h.bf16 %v3829_v8  ;;  %v562_v47 = vunpack.c.l.bf16 %v3856_v14 }
  0xcc   : > { %v3899_v25 = vld [vmem:[%s3723_s21] sm:$0xff]   ;;  %v560_v51 = vunpack.c.l.bf16 %v3847_v12 }
  0xcd   : > { %v3918_v29 = vld [vmem:[%s3723_s21 + $0x20] sm:$0xff]  }
  0xce   : > { %2616 = vmatpush3.bf16.msra.mxu0 %v3819_v6  ;;  %2646 = vmatpush3.bf16.msra.mxu1 %v3826_v7 }
  0xcf   : > { %2617 = vmatprep.subr.bf16.mxu0 %v3829_v8  ;;  %2647 = vmatprep.subr.bf16.mxu1 %v3832_v9 }
  0xd2   : > { %2618 = vmatpush3.bf16.msra.mxu0 %v3829_v8  ;;  %2648 = vmatpush3.bf16.msra.mxu1 %v3832_v9 }
  0xd3   : > { %2619 = vmatprep.subr.bf16.mxu0 %v3836_v10  ;;  %2649 = vmatprep.subr.bf16.mxu1 %v3844_v11 }
  0xd6   : > { %2620 = vmatpush3.bf16.msra.mxu0 %v3836_v10  ;;  %2650 = vmatpush3.bf16.msra.mxu1 %v3844_v11  ;;  %v573_v10 = vmul.f32 %v3931_v33, %v556_v32 }
  0xd7   : > { %2621 = vmatprep.subr.bf16.mxu0 %v3847_v12  ;;  %2651 = vmatprep.subr.bf16.mxu1 %v3853_v13 }
  0xda   : > { %2622 = vmatpush3.bf16.msra.mxu0 %v3847_v12  ;;  %2652 = vmatpush3.bf16.msra.mxu1 %v3853_v13 }
  0xdb   : > { %2623 = vmatprep.subr.bf16.mxu0 %v3856_v14  ;;  %2653 = vmatprep.subr.bf16.mxu1 %v3886_v22 }
  0xde   : > { %2624 = vmatpush3.bf16.msra.mxu0 %v3856_v14  ;;  %2654 = vmatpush3.bf16.msra.mxu1 %v3886_v22 }
  0xdf   : > { %2655 = vmatprep.subr.bf16.mxu1 %v3891_v23  ;;  %2673 = vmatprep.subr.bf16.mxu0 %v3899_v25 }
  0xe1   : > { %2626 = vmatmul.mubr.bf16.vlgmr.msra.gmra.mrb[0].mxu0 %v3864_v15 }
  0xe2   : > { %2629 = vmatprep.mubr.bf16.mxu0 %v3866_v16  ;;  %2656 = vmatpush3.bf16.msra.mxu1 %v3891_v23 }
  0xe3   : > { %2705 = vmatprep.subr.bf16.mxu1 %v3895_v24  ;;  %2674 = vmatpush3.bf16.msra.mxu0 %v3899_v25 }
  0xe4   : > { %2675 = vmatprep.subr.bf16.mxu0 %v3902_v26 }
  0xe7   : > { %2676 = vmatpush3.bf16.msra.mxu0 %v3902_v26 }
  0xe8   : > { %2677 = vmatprep.subr.bf16.mxu0 %v3908_v27 }
  0xe9   : > { %2630 = vmatmul.mubr.bf16.gmra.mrb[4].mxu0 %v3870_v17 }
  0xea   : > { %2633 = vmatprep.mubr.bf16.mxu0 %v3872_v18 }
  0xeb   : > { %2678 = vmatpush3.bf16.msra.mxu0 %v3908_v27 }
  0xec   : > { %2679 = vmatprep.subr.bf16.mxu0 %v3913_v28 }
  0xef   : > { %2680 = vmatpush3.bf16.msra.mxu0 %v3913_v28 }
  0xf0   : > { %2681 = vmatprep.subr.bf16.mxu0 %v3918_v29 }
  0xf1   : > { %2634 = vmatmul.mubr.bf16.gmra.mrb[8].mxu0 %v3876_v19 }
  0xf2   : > { %2637 = vmatprep.mubr.bf16.mxu0 %v3878_v20 }
  0xf3   : > { %2682 = vmatpush3.bf16.msra.mxu0 %v3918_v29 }
  0xf4   : > { %2683 = vmatprep.subr.bf16.mxu0 %v3923_v30 }
  0xf7   : > { %2684 = vmatpush3.bf16.msra.mxu0 %v3923_v30 }
  0xf9   : > { %2638 = vmatmul.mubr.bf16.gmra.mrb[12].mxu0 %v3882_v21 }
 0x1b4   : > { %v2627_v38 = vpop.f32.mrb[0].mxu0 }
 0x1b5   : > { %v485_v41 = vpop.f32.mrb[1].mxu0  ;;  %v583_v43 = vadd.f32 %v2627_v38, %v567_v36  ;;  %v575_v38 = vmul.f32 %v3931_v33, %v558_v1 }
 0x1b6   : > { %v2628_v42 = vpop.f32.mrb[2].mxu0  ;;  %v581_v48 = vadd.f32 %v565_v39, %v485_v41  ;;  %v576_v39 = vmul.f32 %v3931_v33, %v559_v3  ;;  %v574_v41 = vmul.f32 %v3931_v33, %v557_v35 }
 0x1b7   : > { %v584_v44 = vadd.f32 %v2628_v42, %v568_v37  ;;  %v488_v45 = vpop.f32.mrb[3].mxu0  ;;  %v3963_v42 = vld [vmem:[#allocation2 + $0x68] sm:$0xff] }
 0x1b8   : > { %v582_v49 = vadd.f32 %v566_v40, %v488_v45 }
 0x1b9   : > { %v598_v52 = vpack.c.bf16 %v584_v44, %v583_v43 }
 0x1ba   : > { %v597_v53 = vpack.c.bf16 %v582_v49, %v581_v48  ;;  %v563_v48 = vunpack.c.h.bf16 %v3856_v14  ;;  %v577_v14 = vmul.f32 %v3931_v33, %v560_v51 }
 0x1bc   : > { %v2631_v56 = vpop.f32.mrb[4].mxu0  ;;  %2657 = vmatprep.mubr.bf16.mxu1 %v597_v53  ;;  %v561_v53 = vunpack.c.h.bf16 %v3847_v12 }
 0x1bd   : > { %v501_v60 = vpop.f32.mrb[5].mxu0  ;;  %2658 = vmatmul.mubr.bf16.vlgmr.msra.gmra.mrb[0].mxu1 %v598_v52  ;;  %v587_v62 = vadd.f32 %v2631_v56, %v571_v54  ;;  %v3970_v52 = vld [vmem:[#allocation2 + $0x88] sm:$0xff]  ;;  %v579_v56 = vmul.f32 %v3931_v33, %v562_v47 }
 0x1be   : > { %v2632_v61 = vpop.f32.mrb[6].mxu0  ;;  %2706 = vmatpush3.bf16.msra.mxu1 %v3895_v24  ;;  %v585_v6 = vadd.f32 %v569_v57, %v501_v60  ;;  %v580_v57 = vmul.f32 %v3931_v33, %v563_v48  ;;  %v578_v60 = vmul.f32 %v3931_v33, %v561_v53 }
 0x1bf   : > { %v588_v63 = vadd.f32 %v2632_v61, %v572_v55  ;;  %v504_v0 = vpop.f32.mrb[7].mxu0  ;;  %2707 = vmatprep.subr.bf16.mxu1 %v3947_v59  ;;  %v3979_v61 = vld [vmem:[#allocation2 + $0xa8] sm:$0xff] }
 0x1c0   : > { %v586_v31 = vadd.f32 %v570_v58, %v504_v0 }
 0x1c1   : > { %v600_v36 = vpack.c.bf16 %v588_v63, %v587_v62 }
 0x1c2   : > { %v599_v37 = vpack.c.bf16 %v586_v31, %v585_v6  ;;  %2708 = vmatpush3.bf16.msra.mxu1 %v3947_v59  ;;  %v3983_v31 = vld [vmem:[#allocation2 + $0xc8] sm:$0xff] }
 0x1c3   : > { %2709 = vmatprep.subr.bf16.mxu1 %v3954_v34 }
 0x1c4   : > { %v2635_v40 = vpop.f32.mrb[8].mxu0  ;;  %2661 = vmatprep.mubr.bf16.mxu1 %v599_v37  ;;  %v4013_v37 = vld [vmem:[%s3723_s21 + $0x30] sm:$0xff]  }
 0x1c5   : > { %v517_v43 = vpop.f32.mrb[9].mxu0  ;;  %2662 = vmatmul.mubr.bf16.gmra.mrb[4].mxu1 %v600_v36  ;;  %v591_v44 = vadd.f32 %v2635_v40, %v575_v38  ;;  %v3987_v36 = vld [vmem:[#allocation2 + $0xe8] sm:$0xff]  ;;  %2685 = vmatprep.subr.bf16.mxu0 %v4013_v37  ;;  %v4020_v38 = vld [vmem:[%s3723_s21 + $0x38] sm:$0xff]  }
 0x1c6   : > { %v2636_v8 = vpop.f32.mrb[10].mxu0  ;;  %2710 = vmatpush3.bf16.msra.mxu1 %v3954_v34  ;;  %v589_v49 = vadd.f32 %v573_v10, %v517_v43  ;;  %2686 = vmatpush3.bf16.msra.mxu0 %v4013_v37 }
 0x1c7   : > { %v592_v45 = vadd.f32 %v2636_v8, %v576_v39  ;;  %v520_v46 = vpop.f32.mrb[11].mxu0  ;;  %2711 = vmatprep.subr.bf16.mxu1 %v3963_v42  ;;  %2687 = vmatprep.subr.bf16.mxu0 %v4020_v38  ;;  %v4029_v39 = vld [vmem:[%s3738_s13] ss:$0 sm:$0xff] }
 0x1c8   : > { %v590_v50 = vadd.f32 %v574_v41, %v520_v46 }
 0x1c9   : > { %v602_v54 = vpack.c.bf16 %v592_v45, %v591_v44 }
 0x1ca   : > { %v601_v55 = vpack.c.bf16 %v590_v50, %v589_v49  ;;  %2712 = vmatpush3.bf16.msra.mxu1 %v3963_v42  ;;  %2688 = vmatpush3.bf16.msra.mxu0 %v4020_v38 }
 0x1cb   : > { %2713 = vmatprep.subr.bf16.mxu1 %v3970_v52  ;;  %2737 = vmatprep.subr.bf16.mxu0 %v3813_v4 }
 0x1cc   : > { %v2639_v58 = vpop.f32.mrb[12].mxu0  ;;  %2665 = vmatprep.mubr.bf16.mxu1 %v601_v55 }
 0x1cd   : > { %v533_v62 = vpop.f32.mrb[13].mxu0  ;;  %2666 = vmatmul.mubr.bf16.gmra.mrb[8].mxu1 %v602_v54  ;;  %v595_v63 = vadd.f32 %v2639_v58, %v579_v56 }
 0x1ce   : > { %v2640_v12 = vpop.f32.mrb[14].mxu0  ;;  %2714 = vmatpush3.bf16.msra.mxu1 %v3970_v52  ;;  %v593_v3 = vadd.f32 %v577_v14, %v533_v62 }
 0x1cf   : > { %v596_v0 = vadd.f32 %v2640_v12, %v580_v57  ;;  %v536_v1 = vpop.f32.mrb[15].mxu0  ;;  %2715 = vmatprep.subr.bf16.mxu1 %v3979_v61 }
 0x1d0   : > { %v594_v6 = vadd.f32 %v578_v60, %v536_v1 }
 0x1d1   : > { %v604_v32 = vpack.c.bf16 %v596_v0, %v595_v63 }
 0x1d2   : > { %v603_v35 = vpack.c.bf16 %v594_v6, %v593_v3  ;;  %2716 = vmatpush3.bf16.msra.mxu1 %v3979_v61 }
 0x1d3   : > { %2717 = vmatprep.subr.bf16.mxu1 %v3983_v31 }
 0x1d4   : > { %2669 = vmatprep.mubr.bf16.mxu1 %v603_v35 }
 0x1d5   : > { %2670 = vmatmul.mubr.bf16.gmra.mrb[12].mxu1 %v604_v32 }
 0x1d6   : > { %2718 = vmatpush3.bf16.msra.mxu1 %v3983_v31  ;;  %2721 = vmatprep.mubr.bf16.mxu1 %v3805_v2 }
 0x1d7   : > { %2719 = vmatprep.subr.bf16.mxu1 %v3987_v36 }
 0x1da   : > { %2720 = vmatpush3.bf16.msra.mxu1 %v3987_v36 }
 0x1db   : > { %2769 = vmatprep.subr.bf16.mxu1 %v3899_v25 }
 0x1dd   : > { %2722 = vmatmul.mubr.bf16.vlgmr.msra.gmra.mrb[16].mxu1 %v3864_v15 }
 0x1de   : > { %2725 = vmatprep.mubr.bf16.mxu1 %v3866_v16  ;;  %2770 = vmatpush3.bf16.msra.mxu1 %v3899_v25 }
 0x1df   : > { %2771 = vmatprep.subr.bf16.mxu1 %v3902_v26 }
 0x1e2   : > { %2772 = vmatpush3.bf16.msra.mxu1 %v3902_v26 }
 0x1e3   : > { %2773 = vmatprep.subr.bf16.mxu1 %v3908_v27 }
 0x1e5   : > { %2726 = vmatmul.mubr.bf16.gmra.mrb[20].mxu1 %v3870_v17 }
 0x1e6   : > { %2729 = vmatprep.mubr.bf16.mxu1 %v3872_v18  ;;  %2774 = vmatpush3.bf16.msra.mxu1 %v3908_v27 }
 0x1e7   : > { %2775 = vmatprep.subr.bf16.mxu1 %v3913_v28 }
 0x1ea   : > { %2776 = vmatpush3.bf16.msra.mxu1 %v3913_v28 }
 0x1eb   : > { %2777 = vmatprep.subr.bf16.mxu1 %v3918_v29 }
 0x1ed   : > { %2730 = vmatmul.mubr.bf16.gmra.mrb[24].mxu1 %v3876_v19 }
 0x1ee   : > { %2733 = vmatprep.mubr.bf16.mxu1 %v3878_v20  ;;  %2778 = vmatpush3.bf16.msra.mxu1 %v3918_v29 }
 0x1ef   : > { %2779 = vmatprep.subr.bf16.mxu1 %v3923_v30 }
 0x1f2   : > { %2780 = vmatpush3.bf16.msra.mxu1 %v3923_v30 }
 0x1f3   : > { %2781 = vmatprep.subr.bf16.mxu1 %v4013_v37 }
 0x1f5   : > { %2734 = vmatmul.mubr.bf16.gmra.mrb[28].mxu1 %v3882_v21 }
 0x1f6   : > { %2782 = vmatpush3.bf16.msra.mxu1 %v4013_v37 }
 0x1f7   : > { %2783 = vmatprep.subr.bf16.mxu1 %v4020_v38 }
 0x1fa   : > { %2784 = vmatpush3.bf16.msra.mxu1 %v4020_v38 }
 0x1fb   : > { %2833 = vmatprep.subr.bf16.mxu1 %v3813_v4 }
 0x290   : > { %v2659_v40 = vpop.f32.mrb[0].mxu1 }
 0x291   : > { %v702_v10 = vadd.f32 %v2659_v40, %v4029_v39  ;;  %v693_v41 = vpop.f32.mrb[1].mxu1 }
 0x292   : > { %v694_v43 = vadd.f32 %v4029_v39, %v693_v41  ;;  %v2660_v8 = vpop.f32.mrb[2].mxu1 }
 0x293   : > { %v705_v44 = vadd.f32 %v2660_v8, %v4029_v39  ;;  %v696_v45 = vpop.f32.mrb[3].mxu1  ;;  %v758_v47 = vmax.f32 %v702_v10, 0.0 }
 0x294   : > { %v697_v46 = vadd.f32 %v4029_v39, %v696_v45  ;;  %v756_v49 = vmax.f32 %v694_v43, 0.0 }
 0x295   : > { %v759_v48 = vmax.f32 %v705_v44, 0.0 }
 0x296   : > { %v757_v50 = vmax.f32 %v697_v46, 0.0 }
 0x297   : > { %v773_v51 = vpack.c.bf16 %v759_v48, %v758_v47 }
 0x298   : > { %v772_v53 = vpack.c.bf16 %v757_v50, %v756_v49  ;;  %v2663_v54 = vpop.f32.mrb[4].mxu1 }
 0x299   : > { %v718_v55 = vadd.f32 %v2663_v54, %v4029_v39  ;;  %v709_v56 = vpop.f32.mrb[5].mxu1  ;;  %v1054_v54 = vunpack.c.l.bf16 %v3947_v59 }
 0x29a   : > { %v710_v57 = vadd.f32 %v4029_v39, %v709_v56  ;;  %v2664_v58 = vpop.f32.mrb[6].mxu1  ;;  %2689 = vmatprep.mubr.bf16.mxu0 %v772_v53  ;;  %v1052_v56 = vunpack.c.l.bf16 %v3895_v24 }
 0x29b   : > { %v721_v14 = vadd.f32 %v2664_v58, %v4029_v39  ;;  %v712_v60 = vpop.f32.mrb[7].mxu1  ;;  %2690 = vmatmul.mubr.bf16.vlgmr.msra.gmra.mrb[16].mxu0 %v773_v51  ;;  %v762_v12 = vmax.f32 %v718_v55, 0.0 }
 0x29c   : > { %v713_v62 = vadd.f32 %v4029_v39, %v712_v60  ;;  %2738 = vmatpush3.bf16.msra.mxu0 %v3813_v4  ;;  %v760_v0 = vmax.f32 %v710_v57, 0.0  ;;  %v1053_v60 = vunpack.c.h.bf16 %v3895_v24 }
 0x29d   : > { %v763_v63 = vmax.f32 %v721_v14, 0.0  ;;  %2739 = vmatprep.subr.bf16.mxu0 %v3817_v5 }
 0x29e   : > { %v761_v1 = vmax.f32 %v713_v62, 0.0 }
 0x29f   : > { %v775_v3 = vpack.c.bf16 %v763_v63, %v762_v12  ;;  %v1070_v63 = vmul.f32 %v1054_v54, %v3931_v33 }
 0x2a0   : > { %v774_v6 = vpack.c.bf16 %v761_v1, %v760_v0  ;;  %2740 = vmatpush3.bf16.msra.mxu0 %v3817_v5  ;;  %v2667_v32 = vpop.f32.mrb[8].mxu1 }
 0x2a1   : > { %v734_v35 = vadd.f32 %v2667_v32, %v4029_v39  ;;  %v725_v40 = vpop.f32.mrb[9].mxu1  ;;  %2741 = vmatprep.subr.bf16.mxu0 %v3826_v7 }
 0x2a2   : > { %v726_v10 = vadd.f32 %v4029_v39, %v725_v40  ;;  %v2668_v41 = vpop.f32.mrb[10].mxu1  ;;  %2693 = vmatprep.mubr.bf16.mxu0 %v774_v6  ;;  %v1069_v40 = vmul.f32 %v1053_v60, %v3931_v33 }
 0x2a3   : > { %v737_v43 = vadd.f32 %v2668_v41, %v4029_v39  ;;  %v728_v8 = vpop.f32.mrb[11].mxu1  ;;  %2694 = vmatmul.mubr.bf16.gmra.mrb[20].mxu0 %v775_v3  ;;  %v766_v45 = vmax.f32 %v734_v35, 0.0  ;;  %v1068_v3 = vmul.f32 %v1052_v56, %v3931_v33  ;;  %v1058_v41 = vunpack.c.l.bf16 %v3963_v42 }
 0x2a4   : > { %v729_v44 = vadd.f32 %v4029_v39, %v728_v8  ;;  %2742 = vmatpush3.bf16.msra.mxu0 %v3826_v7  ;;  %v764_v46 = vmax.f32 %v726_v10, 0.0  ;;  %v1062_v56 = vunpack.c.l.bf16 %v3979_v61 }
 0x2a5   : > { %v767_v5 = vmax.f32 %v737_v43, 0.0  ;;  %2743 = vmatprep.subr.bf16.mxu0 %v3832_v9 }
 0x2a6   : > { %v765_v47 = vmax.f32 %v729_v44, 0.0  ;;  %v1056_v44 = vunpack.c.l.bf16 %v3954_v34 }
 0x2a7   : > { %v777_v48 = vpack.c.bf16 %v767_v5, %v766_v45 }
 0x2a8   : > { %v776_v49 = vpack.c.bf16 %v765_v47, %v764_v46  ;;  %2744 = vmatpush3.bf16.msra.mxu0 %v3832_v9  ;;  %v2671_v50 = vpop.f32.mrb[12].mxu1  ;;  %v1055_v9 = vunpack.c.h.bf16 %v3947_v59  ;;  %v1059_v46 = vunpack.c.h.bf16 %v3963_v42  ;;  %v1057_v47 = vunpack.c.h.bf16 %v3954_v34 }
 0x2a9   : > { %v750_v51 = vadd.f32 %v2671_v50, %v4029_v39  ;;  %v741_v53 = vpop.f32.mrb[13].mxu1  ;;  %2745 = vmatprep.subr.bf16.mxu0 %v3844_v11 }
 0x2aa   : > { %v742_v7 = vadd.f32 %v4029_v39, %v741_v53  ;;  %v2672_v55 = vpop.f32.mrb[14].mxu1  ;;  %2697 = vmatprep.mubr.bf16.mxu0 %v776_v49  ;;  %v1071_v32 = vmul.f32 %v1055_v9, %v3931_v33  ;;  %v1074_v49 = vmul.f32 %v1058_v41, %v3931_v33  ;;  %v4075_v53 = vld [vmem:[#allocation2 + $0x10] sm:$0xff]  ;;  %v1075_v54 = vmul.f32 %v1059_v46, %v3931_v33 }
 0x2ab   : > { %v753_v57 = vadd.f32 %v2672_v55, %v4029_v39  ;;  %v744_v58 = vpop.f32.mrb[15].mxu1  ;;  %2698 = vmatmul.mubr.bf16.gmra.mrb[24].mxu0 %v777_v48  ;;  %v770_v62 = vmax.f32 %v750_v51, 0.0  ;;  %v1072_v51 = vmul.f32 %v1056_v44, %v3931_v33  ;;  %v4082_v9 = vld [vmem:[#allocation2 + $0x30] sm:$0xff] }
 0x2ac   : > { %v745_v14 = vadd.f32 %v4029_v39, %v744_v58  ;;  %2746 = vmatpush3.bf16.msra.mxu0 %v3844_v11  ;;  %v768_v0 = vmax.f32 %v742_v7, 0.0  ;;  %v1073_v7 = vmul.f32 %v1057_v47, %v3931_v33 }
 0x2ad   : > { %v771_v12 = vmax.f32 %v753_v57, 0.0  ;;  %2747 = vmatprep.subr.bf16.mxu0 %v3853_v13 }
 0x2ae   : > { %v769_v1 = vmax.f32 %v745_v14, 0.0  ;;  %v1060_v14 = vunpack.c.l.bf16 %v3970_v52 }
 0x2af   : > { %v779_v6 = vpack.c.bf16 %v771_v12, %v770_v62 }
 0x2b0   : > { %v778_v59 = vpack.c.bf16 %v769_v1, %v768_v0  ;;  %2748 = vmatpush3.bf16.msra.mxu0 %v3853_v13  ;;  %v2723_v35 = vpop.f32.mrb[16].mxu1  ;;  %v1078_v1 = vmul.f32 %v1062_v56, %v3931_v33  ;;  %v4113_v56 = vld [vmem:[#allocation2 + $0xb0] sm:$0xff] }
 0x2b1   : > { %v1086_v24 = vadd.f32 %v2723_v35, %v1070_v63  ;;  %v989_v10 = vpop.f32.mrb[17].mxu1  ;;  %2749 = vmatprep.subr.bf16.mxu0 %v3886_v22  ;;  %v1061_v63 = vunpack.c.h.bf16 %v3970_v52 }
 0x2b2   : > { %v1084_v43 = vadd.f32 %v1068_v3, %v989_v10  ;;  %2701 = vmatprep.mubr.bf16.mxu0 %v778_v59  ;;  %v2724_v8 = vpop.f32.mrb[18].mxu1 }
 0x2b3   : > { %v1087_v45 = vadd.f32 %v2724_v8, %v1071_v32  ;;  %2702 = vmatmul.mubr.bf16.gmra.mrb[28].mxu0 %v779_v6  ;;  %v992_v5 = vpop.f32.mrb[19].mxu1  ;;  %v1076_v6 = vmul.f32 %v1060_v14, %v3931_v33  ;;  %v4091_v32 = vld [vmem:[#allocation2 + $0x50] sm:$0xff]  ;;  %v1064_v8 = vunpack.c.l.bf16 %v3983_v31 }
 0x2b4   : > { %v1085_v13 = vadd.f32 %v1069_v40, %v992_v5  ;;  %2750 = vmatpush3.bf16.msra.mxu0 %v3886_v22  ;;  %v1067_v5 = vunpack.c.h.bf16 %v3987_v36 }
 0x2b5   : > { %v1101_v48 = vpack.c.bf16 %v1087_v45, %v1086_v24  ;;  %2751 = vmatprep.subr.bf16.mxu0 %v3891_v23  ;;  %v1066_v24 = vunpack.c.l.bf16 %v3987_v36 }
 0x2b6   : > { %v1100_v50 = vpack.c.bf16 %v1085_v13, %v1084_v43  ;;  %v4098_v43 = vld [vmem:[#allocation2 + $0x70] sm:$0xff]  ;;  %v1065_v13 = vunpack.c.h.bf16 %v3983_v31 }
 0x2b8   : > { %2752 = vmatpush3.bf16.msra.mxu0 %v3891_v23  ;;  %v2727_v42 = vpop.f32.mrb[20].mxu1  ;;  %2753 = vmatprep.mubr.bf16.mxu0 %v1100_v50  ;;  %v1063_v23 = vunpack.c.h.bf16 %v3979_v61  ;;  %v1077_v61 = vmul.f32 %v1061_v63, %v3931_v33  ;;  %v1080_v50 = vmul.f32 %v1064_v8, %v3931_v33  ;;  %v1081_v36 = vmul.f32 %v1065_v13, %v3931_v33 }
 0x2b9   : > { %v1090_v55 = vadd.f32 %v2727_v42, %v1074_v49  ;;  %v1005_v34 = vpop.f32.mrb[21].mxu1  ;;  %2801 = vmatprep.subr.bf16.mxu0 %v4075_v53 }
 0x2ba   : > { %v1088_v57 = vadd.f32 %v1072_v51, %v1005_v34  ;;  %v2728_v58 = vpop.f32.mrb[22].mxu1  ;;  %v1079_v59 = vmul.f32 %v1063_v23, %v3931_v33  ;;  %v4107_v51 = vld [vmem:[#allocation2 + $0x90] sm:$0xff] }
 0x2bb   : > { %v1091_v60 = vadd.f32 %v2728_v58, %v1075_v54  ;;  %v1008_v62 = vpop.f32.mrb[23].mxu1  ;;  %2754 = vmatmul.mubr.bf16.vlgmr.msra.gmra.mrb[32].mxu0 %v1101_v48  ;;  %v1082_v48 = vmul.f32 %v1066_v24, %v3931_v33  ;;  %v1083_v54 = vmul.f32 %v1067_v5, %v3931_v33  ;;  %v4117_v23 = vld [vmem:[#allocation2 + $0xd0] sm:$0xff] }
 0x2bc   : > { %v1089_v12 = vadd.f32 %v1073_v7, %v1008_v62  ;;  %2802 = vmatpush3.bf16.msra.mxu0 %v4075_v53 }
 0x2bd   : > { %v1103_v0 = vpack.c.bf16 %v1091_v60, %v1090_v55  ;;  %2803 = vmatprep.subr.bf16.mxu0 %v4082_v9 }
 0x2be   : > { %v1102_v3 = vpack.c.bf16 %v1089_v12, %v1088_v57  ;;  %v4121_v12 = vld [vmem:[#allocation2 + $0xf0] sm:$0xff] }
 0x2c0   : > { %v2731_v35 = vpop.f32.mrb[24].mxu1  ;;  %2757 = vmatprep.mubr.bf16.mxu0 %v1102_v3  ;;  %2804 = vmatpush3.bf16.msra.mxu0 %v4082_v9 }
 0x2c1   : > { %v1094_v40 = vadd.f32 %v2731_v35, %v1078_v1  ;;  %v1021_v52 = vpop.f32.mrb[25].mxu1  ;;  %2805 = vmatprep.subr.bf16.mxu0 %v4091_v32 }
 0x2c2   : > { %v1092_v10 = vadd.f32 %v1076_v6, %v1021_v52  ;;  %v2732_v41 = vpop.f32.mrb[26].mxu1 }
 0x2c3   : > { %v1095_v44 = vadd.f32 %v2732_v41, %v1079_v59  ;;  %v1024_v45 = vpop.f32.mrb[27].mxu1  ;;  %2758 = vmatmul.mubr.bf16.gmra.mrb[36].mxu0 %v1103_v0 }
 0x2c4   : > { %v1093_v46 = vadd.f32 %v1077_v61, %v1024_v45  ;;  %2806 = vmatpush3.bf16.msra.mxu0 %v4091_v32 }
 0x2c5   : > { %v1105_v47 = vpack.c.bf16 %v1095_v44, %v1094_v40  ;;  %2807 = vmatprep.subr.bf16.mxu0 %v4098_v43 }
 0x2c6   : > { %v1104_v49 = vpack.c.bf16 %v1093_v46, %v1092_v10 }
 0x2c8   : > { %v2735_v42 = vpop.f32.mrb[28].mxu1  ;;  %2761 = vmatprep.mubr.bf16.mxu0 %v1104_v49  ;;  %2808 = vmatpush3.bf16.msra.mxu0 %v4098_v43 }
 0x2c9   : > { %v1098_v7 = vadd.f32 %v2735_v42, %v1082_v48  ;;  %v1037_v31 = vpop.f32.mrb[29].mxu1  ;;  %2809 = vmatprep.subr.bf16.mxu0 %v4107_v51 }
 0x2ca   : > { %v1096_v55 = vadd.f32 %v1080_v50, %v1037_v31  ;;  %v2736_v34 = vpop.f32.mrb[30].mxu1 }
 0x2cb   : > { %v1099_v57 = vadd.f32 %v2736_v34, %v1083_v54  ;;  %v1040_v58 = vpop.f32.mrb[31].mxu1  ;;  %2762 = vmatmul.mubr.bf16.gmra.mrb[40].mxu0 %v1105_v47 }
 0x2cc   : > { %v1097_v14 = vadd.f32 %v1081_v36, %v1040_v58  ;;  %2810 = vmatpush3.bf16.msra.mxu0 %v4107_v51 }
 0x2cd   : > { %v1107_v60 = vpack.c.bf16 %v1099_v57, %v1098_v7  ;;  %2811 = vmatprep.subr.bf16.mxu0 %v4113_v56 }
 0x2ce   : > { %v1106_v62 = vpack.c.bf16 %v1097_v14, %v1096_v55 }
 0x2d0   : > { %2765 = vmatprep.mubr.bf16.mxu0 %v1106_v62  ;;  %2812 = vmatpush3.bf16.msra.mxu0 %v4113_v56 }
 0x2d1   : > { %2813 = vmatprep.subr.bf16.mxu0 %v4117_v23 }
 0x2d3   : > { %2766 = vmatmul.mubr.bf16.gmra.mrb[44].mxu0 %v1107_v60 }
 0x2d4   : > { %2814 = vmatpush3.bf16.msra.mxu0 %v4117_v23  ;;  %2817 = vmatprep.mubr.bf16.mxu0 %v3805_v2 }
 0x2d5   : > { %2815 = vmatprep.subr.bf16.mxu0 %v4121_v12 }
 0x2d8   : > { %2816 = vmatpush3.bf16.msra.mxu0 %v4121_v12 }
 0x2d9   : > { %2865 = vmatprep.subr.bf16.mxu0 %v3899_v25 }
 0x2db   : > { %2818 = vmatmul.mubr.bf16.vlgmr.msra.gmra.mrb[48].mxu0 %v3864_v15  ;;  %v4152_v15 = vld [vmem:[%s3743_s23] ss:$0 sm:$0xff] }
 0x2dc   : > { %2821 = vmatprep.mubr.bf16.mxu0 %v3866_v16  ;;  %2866 = vmatpush3.bf16.msra.mxu0 %v3899_v25 }
 0x2dd   : > { %2867 = vmatprep.subr.bf16.mxu0 %v3902_v26 }
 0x2e0   : > { %2868 = vmatpush3.bf16.msra.mxu0 %v3902_v26 }
 0x2e1   : > { %2869 = vmatprep.subr.bf16.mxu0 %v3908_v27 }
 0x2e3   : > { %2822 = vmatmul.mubr.bf16.gmra.mrb[52].mxu0 %v3870_v17 }
 0x2e4   : > { %2825 = vmatprep.mubr.bf16.mxu0 %v3872_v18  ;;  %2870 = vmatpush3.bf16.msra.mxu0 %v3908_v27 }
 0x2e5   : > { %2871 = vmatprep.subr.bf16.mxu0 %v3913_v28 }
 0x2e8   : > { %2872 = vmatpush3.bf16.msra.mxu0 %v3913_v28 }
 0x2e9   : > { %2873 = vmatprep.subr.bf16.mxu0 %v3918_v29 }
 0x2eb   : > { %2826 = vmatmul.mubr.bf16.gmra.mrb[56].mxu0 %v3876_v19 }
 0x2ec   : > { %2829 = vmatprep.mubr.bf16.mxu0 %v3878_v20  ;;  %2874 = vmatpush3.bf16.msra.mxu0 %v3918_v29 }
 0x2ed   : > { %2875 = vmatprep.subr.bf16.mxu0 %v3923_v30 }
 0x2f0   : > { %2876 = vmatpush3.bf16.msra.mxu0 %v3923_v30 }
 0x2f1   : > { %2877 = vmatprep.subr.bf16.mxu0 %v4013_v37 }
 0x2f3   : > { %2830 = vmatmul.mubr.bf16.gmra.mrb[60].mxu0 %v3882_v21 }
 0x2f4   : > { %2878 = vmatpush3.bf16.msra.mxu0 %v4013_v37 }
 0x2f5   : > { %2879 = vmatprep.subr.bf16.mxu0 %v4020_v38 }
 0x2f8   : > { %2880 = vmatpush3.bf16.msra.mxu0 %v4020_v38 }
 0x2f9   : > { %2929 = vmatprep.subr.bf16.mxu0 %v3813_v4 }
 0x36e   : > { %v2691_v2 = vpop.f32.mrb[16].mxu0 }
 0x36f   : > { %v868_v16 = vpop.f32.mrb[17].mxu0  ;;  %v4155_v18 = vadd.f32 %v2691_v2, %v4152_v15 }
 0x370   : > { %v2692_v17 = vpop.f32.mrb[18].mxu0  ;;  %v4161_v21 = vadd.f32 %v4152_v15, %v868_v16 }
 0x371   : > { %v4158_v19 = vadd.f32 %v2692_v17, %v4152_v15  ;;  %v871_v20 = vpop.f32.mrb[19].mxu0 }
 0x372   : > { %v4164_v25 = vadd.f32 %v4152_v15, %v871_v20 }
 0x373   : > { %v932_v4 = vpack.c.bf16 %v4158_v19, %v4155_v18 }
 0x374   : > { %v931_v26 = vpack.c.bf16 %v4164_v25, %v4161_v21 }
 0x375   : > { %940 = vst [vmem:[#allocation2 + $0x20] sm:$0xff] %v932_v4 }
 0x376   : > { %939 = vst [vmem:[#allocation2] sm:$0xff] %v931_v26  ;;  %v2695_v27 = vpop.f32.mrb[20].mxu0 }
 0x377   : > { %v884_v28 = vpop.f32.mrb[21].mxu0  ;;  %v4171_v30 = vadd.f32 %v2695_v27, %v4152_v15 }
 0x378   : > { %v2696_v29 = vpop.f32.mrb[22].mxu0  ;;  %v4177_v1 = vadd.f32 %v4152_v15, %v884_v28 }
 0x379   : > { %v4174_v63 = vadd.f32 %v2696_v29, %v4152_v15  ;;  %v887_v0 = vpop.f32.mrb[23].mxu0 }
 0x37a   : > { %v4180_v3 = vadd.f32 %v4152_v15, %v887_v0 }
 0x37b   : > { %v934_v6 = vpack.c.bf16 %v4174_v63, %v4171_v30 }
 0x37c   : > { %v933_v59 = vpack.c.bf16 %v4180_v3, %v4177_v1 }
 0x37d   : > { %942 = vst [vmem:[#allocation2 + $0x60] sm:$0xff] %v934_v6 }
 0x37e   : > { %941 = vst [vmem:[#allocation2 + $0x40] sm:$0xff] %v933_v59  ;;  %v2699_v35 = vpop.f32.mrb[24].mxu0 }
 0x37f   : > { %v900_v61 = vpop.f32.mrb[25].mxu0  ;;  %v4187_v52 = vadd.f32 %v2699_v35, %v4152_v15 }
 0x380   : > { %v2700_v40 = vpop.f32.mrb[26].mxu0  ;;  %v4193_v41 = vadd.f32 %v4152_v15, %v900_v61  ;;  %v4227_v61 = vld [vmem:[%s3717_s19] sm:$0xff]  }
 0x381   : > { %v4190_v24 = vadd.f32 %v2700_v40, %v4152_v15  ;;  %v903_v10 = vpop.f32.mrb[27].mxu0 }
 0x382   : > { %v4196_v8 = vadd.f32 %v4152_v15, %v903_v10 }
 0x383   : > { %v936_v44 = vpack.c.bf16 %v4190_v24, %v4187_v52 }
 0x384   : > { %v935_v45 = vpack.c.bf16 %v4196_v8, %v4193_v41 }
 0x385   : > { %944 = vst [vmem:[#allocation2 + $0xa0] sm:$0xff] %v936_v44  ;;  %v4231_v44 = vld [vmem:[%s3717_s19 + $0x8] sm:$0xff]  }
 0x386   : > { %943 = vst [vmem:[#allocation2 + $0x80] sm:$0xff] %v935_v45  ;;  %v2703_v5 = vpop.f32.mrb[28].mxu0 }
 0x387   : > { %v916_v46 = vpop.f32.mrb[29].mxu0  ;;  %v4203_v47 = vadd.f32 %v2703_v5, %v4152_v15 }
 0x388   : > { %v2704_v13 = vpop.f32.mrb[30].mxu0  ;;  %v4209_v50 = vadd.f32 %v4152_v15, %v916_v46 }
 0x389   : > { %v4206_v48 = vadd.f32 %v2704_v13, %v4152_v15  ;;  %v919_v49 = vpop.f32.mrb[31].mxu0 }
 0x38a   : > { %v4212_v54 = vadd.f32 %v4152_v15, %v919_v49 }
 0x38b   : > { %4763 = vst [vmem:[#allocation34_spill] sm:$0xff] %v4206_v48  ;;  %v938_v42 = vpack.c.bf16 %v4206_v48, %v4203_v47 }
 0x38c   : > { %4764 = vst [vmem:[#allocation35_spill] sm:$0xff] %v4212_v54  ;;  %v937_v36 = vpack.c.bf16 %v4212_v54, %v4209_v50 }
 0x38d   : > { %946 = vst [vmem:[#allocation2 + $0xe0] sm:$0xff] %v938_v42 }
 0x38e   : > { %945 = vst [vmem:[#allocation2 + $0xc0] sm:$0xff] %v937_v36  ;;  %v2755_v7 = vpop.f32.mrb[32].mxu0 }
 0x38f   : > { %v1151_v31 = vadd.f32 %v2755_v7, %v4029_v39  ;;  %v1142_v55 = vpop.f32.mrb[33].mxu0  ;;  %v4237_v7 = vld [vmem:[%s3717_s19 + $0x10] sm:$0xff]  }
 0x390   : > { %v1143_v34 = vadd.f32 %v4029_v39, %v1142_v55  ;;  %v2756_v57 = vpop.f32.mrb[34].mxu0 }
 0x391   : > { %v1154_v58 = vadd.f32 %v2756_v57, %v4029_v39  ;;  %v1145_v14 = vpop.f32.mrb[35].mxu0  ;;  %v1207_v62 = vmax.f32 %v1151_v31, 0.0 }
 0x392   : > { %v1146_v60 = vadd.f32 %v4029_v39, %v1145_v14  ;;  %v1205_v16 = vmax.f32 %v1143_v34, 0.0 }
 0x393   : > { %v1208_v2 = vmax.f32 %v1154_v58, 0.0 }
 0x394   : > { %v1206_v17 = vmax.f32 %v1146_v60, 0.0 }
 0x395   : > { %v1222_v20 = vpack.c.bf16 %v1208_v2, %v1207_v62  ;;  %v4245_v62 = vld [vmem:[%s3717_s19 + $0x18] sm:$0xff]  }
 0x396   : > { %v1221_v4 = vpack.c.bf16 %v1206_v17, %v1205_v16  ;;  %v2759_v26 = vpop.f32.mrb[36].mxu0 }
 0x397   : > { %v1167_v27 = vadd.f32 %v2759_v26, %v4029_v39  ;;  %v1158_v28 = vpop.f32.mrb[37].mxu0 }
 0x398   : > { %v1159_v29 = vadd.f32 %v4029_v39, %v1158_v28  ;;  %v2760_v0 = vpop.f32.mrb[38].mxu0  ;;  %2785 = vmatprep.mubr.bf16.mxu1 %v1221_v4  ;;  %v1465_v28 = vunpack.c.l.bf16 %v4082_v9 }
 0x399   : > { %v1170_v6 = vadd.f32 %v2760_v0, %v4029_v39  ;;  %v1161_v59 = vpop.f32.mrb[39].mxu0  ;;  %2786 = vmatmul.mubr.bf16.vlgmr.msra.gmra.mrb[32].mxu1 %v1222_v20  ;;  %v1211_v40 = vmax.f32 %v1167_v27, 0.0 }
 0x39a   : > { %v1162_v35 = vadd.f32 %v4029_v39, %v1161_v59  ;;  %2834 = vmatpush3.bf16.msra.mxu1 %v4227_v61  ;;  %v1209_v45 = vmax.f32 %v1159_v29, 0.0 }
 0x39b   : > { %v1212_v10 = vmax.f32 %v1170_v6, 0.0  ;;  %2835 = vmatprep.subr.bf16.mxu1 %v4231_v44  ;;  %v1463_v6 = vunpack.c.l.bf16 %v4075_v53 }
 0x39c   : > { %v1210_v5 = vmax.f32 %v1162_v35, 0.0 }
 0x39d   : > { %v1224_v46 = vpack.c.bf16 %v1212_v10, %v1211_v40  ;;  %v1466_v40 = vunpack.c.h.bf16 %v4082_v9  ;;  %v1479_v9 = vmul.f32 %v1463_v6, %v3931_v33 }
 0x39e   : > { %v1223_v13 = vpack.c.bf16 %v1210_v5, %v1209_v45  ;;  %2836 = vmatpush3.bf16.msra.mxu1 %v4231_v44  ;;  %v2763_v49 = vpop.f32.mrb[40].mxu0  ;;  %v4258_v45 = vld [vmem:[%s3717_s19 + $0x20] sm:$0xff]  }
 0x39f   : > { %v1183_v42 = vadd.f32 %v2763_v49, %v4029_v39  ;;  %v1174_v36 = vpop.f32.mrb[41].mxu0  ;;  %2837 = vmatprep.subr.bf16.mxu1 %v4237_v7  ;;  %v1481_v49 = vmul.f32 %v1465_v28, %v3931_v33  ;;  %v1468_v28 = vunpack.c.h.bf16 %v4091_v32 }
 0x3a0   : > { %v1175_v31 = vadd.f32 %v4029_v39, %v1174_v36  ;;  %v2764_v55 = vpop.f32.mrb[42].mxu0  ;;  %2789 = vmatprep.mubr.bf16.mxu1 %v1223_v13  ;;  %v4263_v13 = vld [vmem:[%s3717_s19 + $0x28] sm:$0xff]  }
 0x3a1   : > { %v1186_v34 = vadd.f32 %v2764_v55, %v4029_v39  ;;  %v1177_v57 = vpop.f32.mrb[43].mxu0  ;;  %2790 = vmatmul.mubr.bf16.gmra.mrb[36].mxu1 %v1224_v46  ;;  %v1215_v14 = vmax.f32 %v1183_v42, 0.0 }
 0x3a2   : > { %v1178_v58 = vadd.f32 %v4029_v39, %v1177_v57  ;;  %2838 = vmatpush3.bf16.msra.mxu1 %v4237_v7  ;;  %v1213_v2 = vmax.f32 %v1175_v31, 0.0 }
 0x3a3   : > { %v1216_v60 = vmax.f32 %v1186_v34, 0.0  ;;  %2839 = vmatprep.subr.bf16.mxu1 %v4245_v62 }
 0x3a4   : > { %v1214_v16 = vmax.f32 %v1178_v58, 0.0 }
 0x3a5   : > { %v1226_v17 = vpack.c.bf16 %v1216_v60, %v1215_v14  ;;  %v1469_v14 = vunpack.c.l.bf16 %v4098_v43 }
 0x3a6   : > { %v1225_v20 = vpack.c.bf16 %v1214_v16, %v1213_v2  ;;  %2840 = vmatpush3.bf16.msra.mxu1 %v4245_v62  ;;  %v2767_v4 = vpop.f32.mrb[44].mxu0  ;;  %v1467_v16 = vunpack.c.l.bf16 %v4091_v32  ;;  %v1484_v32 = vmul.f32 %v1468_v28, %v3931_v33  ;;  %v4309_v28 = vld [vmem:[#allocation2 + $0x78] sm:$0xff] }
 0x3a7   : > { %v1199_v26 = vadd.f32 %v2767_v4, %v4029_v39  ;;  %v1190_v27 = vpop.f32.mrb[45].mxu0  ;;  %2841 = vmatprep.subr.bf16.mxu1 %v3844_v11  ;;  %v1464_v11 = vunpack.c.h.bf16 %v4075_v53  ;;  %v1470_v4 = vunpack.c.h.bf16 %v4098_v43 }
 0x3a8   : > { %v1191_v29 = vadd.f32 %v4029_v39, %v1190_v27  ;;  %v2768_v0 = vpop.f32.mrb[46].mxu0  ;;  %2793 = vmatprep.mubr.bf16.mxu1 %v1225_v20  ;;  %v4276_v27 = vld [vmem:[%s3717_s19 + $0x30] sm:$0xff]  }
 0x3a9   : > { %v1202_v59 = vadd.f32 %v2768_v0, %v4029_v39  ;;  %v1193_v35 = vpop.f32.mrb[47].mxu0  ;;  %2794 = vmatmul.mubr.bf16.gmra.mrb[40].mxu1 %v1226_v17  ;;  %v1219_v5 = vmax.f32 %v1199_v26, 0.0  ;;  %v1480_v34 = vmul.f32 %v1464_v11, %v3931_v33  ;;  %v1485_v0 = vmul.f32 %v1469_v14, %v3931_v33 }
 0x3aa   : > { %v1194_v10 = vadd.f32 %v4029_v39, %v1193_v35  ;;  %2842 = vmatpush3.bf16.msra.mxu1 %v4258_v45  ;;  %v1217_v42 = vmax.f32 %v1191_v29, 0.0  ;;  %v1482_v39 = vmul.f32 %v1466_v40, %v3931_v33  ;;  %v4281_v29 = vld [vmem:[%s3717_s19 + $0x38] sm:$0xff]   ;;  %v1486_v43 = vmul.f32 %v1470_v4, %v3931_v33 }
 0x3ab   : > { %v1220_v46 = vmax.f32 %v1202_v59, 0.0  ;;  %2843 = vmatprep.subr.bf16.mxu1 %v4263_v13  ;;  %v1483_v59 = vmul.f32 %v1467_v16, %v3931_v33  ;;  %v4286_v35 = vld [vmem:[#allocation2 + $0x18] sm:$0xff] }
 0x3ac   : > { %v1218_v36 = vmax.f32 %v1194_v10, 0.0 }
 0x3ad   : > { %v1228_v31 = vpack.c.bf16 %v1220_v46, %v1219_v5  ;;  %v1473_v5 = vunpack.c.l.bf16 %v4113_v56 }
 0x3ae   : > { %v1227_v55 = vpack.c.bf16 %v1218_v36, %v1217_v42  ;;  %2844 = vmatpush3.bf16.msra.mxu1 %v4263_v13  ;;  %v2819_v53 = vpop.f32.mrb[48].mxu0  ;;  %v4293_v42 = vld [vmem:[#allocation2 + $0x38] sm:$0xff]  ;;  %v1471_v36 = vunpack.c.l.bf16 %v4107_v51 }
 0x3af   : > { %v1497_v57 = vadd.f32 %v2819_v53, %v1481_v49  ;;  %v1400_v58 = vpop.f32.mrb[49].mxu0  ;;  %2845 = vmatprep.subr.bf16.mxu1 %v3886_v22  ;;  %v1472_v53 = vunpack.c.h.bf16 %v4107_v51 }
 0x3b0   : > { %v1495_v60 = vadd.f32 %v1479_v9, %v1400_v58  ;;  %2797 = vmatprep.mubr.bf16.mxu1 %v1227_v55  ;;  %v2820_v2 = vpop.f32.mrb[50].mxu0  ;;  %v1487_v14 = vmul.f32 %v1471_v36, %v3931_v33 }
 0x3b1   : > { %v1498_v17 = vadd.f32 %v2820_v2, %v1482_v39  ;;  %2798 = vmatmul.mubr.bf16.gmra.mrb[44].mxu1 %v1228_v31  ;;  %v1403_v20 = vpop.f32.mrb[51].mxu0  ;;  %v1474_v39 = vunpack.c.h.bf16 %v4113_v56  ;;  %v1488_v56 = vmul.f32 %v1472_v53, %v3931_v33 }
 0x3b2   : > { %v1496_v26 = vadd.f32 %v1480_v34, %v1403_v20  ;;  %2846 = vmatpush3.bf16.msra.mxu1 %v4276_v27  ;;  %v1477_v20 = vunpack.c.l.bf16 %v4121_v12 }
 0x3b3   : > { %v1512_v22 = vpack.c.bf16 %v1498_v17, %v1497_v57  ;;  %2847 = vmatprep.subr.bf16.mxu1 %v4281_v29  ;;  %v1489_v57 = vmul.f32 %v1473_v5, %v3931_v33  ;;  %v1490_v2 = vmul.f32 %v1474_v39, %v3931_v33 }
 0x3b4   : > { %v1511_v6 = vpack.c.bf16 %v1496_v26, %v1495_v60  ;;  %v4302_v60 = vld [vmem:[#allocation2 + $0x58] sm:$0xff] }
 0x3b6   : > { %2848 = vmatpush3.bf16.msra.mxu1 %v4281_v29  ;;  %v2823_v40 = vpop.f32.mrb[52].mxu0  ;;  %2849 = vmatprep.mubr.bf16.mxu1 %v1511_v6 }
 0x3b7   : > { %v1501_v10 = vadd.f32 %v2823_v40, %v1485_v0  ;;  %v1416_v11 = vpop.f32.mrb[53].mxu0  ;;  %2897 = vmatprep.subr.bf16.mxu1 %v4286_v35  ;;  %v1476_v40 = vunpack.c.h.bf16 %v4117_v23 }
 0x3b8   : > { %v1499_v46 = vadd.f32 %v1483_v59, %v1416_v11  ;;  %v2824_v49 = vpop.f32.mrb[54].mxu0  ;;  %v1478_v59 = vunpack.c.h.bf16 %v4121_v12 }
 0x3b9   : > { %v1502_v9 = vadd.f32 %v2824_v49, %v1486_v43  ;;  %v1419_v31 = vpop.f32.mrb[55].mxu0  ;;  %2850 = vmatmul.mubr.bf16.vlgmr.msra.gmra.mrb[48].mxu1 %v1512_v22  ;;  %v1475_v22 = vunpack.c.l.bf16 %v4117_v23  ;;  %v1492_v12 = vmul.f32 %v1476_v40, %v3931_v33  ;;  %v3176_v40 = vld [vmem:[#allocation3 + $0x30] sm:$0xff] }
 0x3ba   : > { %v1500_v55 = vadd.f32 %v1484_v32, %v1419_v31  ;;  %2898 = vmatpush3.bf16.msra.mxu1 %v4286_v35  ;;  %v1494_v49 = vmul.f32 %v1478_v59, %v3931_v33  ;;  %v3174_v59 = vld [vmem:[%s3723_s21 + $0x20] sm:$0xff]  }
 0x3bb   : > { %v1514_v34 = vpack.c.bf16 %v1502_v9, %v1501_v10  ;;  %2899 = vmatprep.subr.bf16.mxu1 %v4293_v42  ;;  %v1493_v10 = vmul.f32 %v1477_v20, %v3931_v33  ;;  %v1491_v5 = vmul.f32 %v1475_v22, %v3931_v33  ;;  %v3168_v20 = vld [vmem:[#allocation3 + $0x10] sm:$0xff]  ;;  %v3171_v22 = vld [vmem:[#allocation3 + $0x18] sm:$0xff] }
 0x3bc   : > { %v1513_v58 = vpack.c.bf16 %v1500_v55, %v1499_v46  ;;  %v4318_v46 = vld [vmem:[#allocation2 + $0x98] sm:$0xff] }
 0x3bd   : > { %v4324_v55 = vld [vmem:[#allocation2 + $0xb8] sm:$0xff] }
 0x3be   : > { %v2827_v16 = vpop.f32.mrb[56].mxu0  ;;  %2853 = vmatprep.mubr.bf16.mxu1 %v1513_v58  ;;  %2900 = vmatpush3.bf16.msra.mxu1 %v4293_v42 }
 0x3bf   : > { %v1505_v17 = vadd.f32 %v2827_v16, %v1489_v57  ;;  %v1432_v51 = vpop.f32.mrb[57].mxu0  ;;  %2901 = vmatprep.subr.bf16.mxu1 %v4302_v60  ;;  %v4332_v16 = vld [vmem:[#allocation2 + $0xf8] sm:$0xff] }
 0x3c0   : > { %v1503_v4 = vadd.f32 %v1487_v14, %v1432_v51  ;;  %v2828_v26 = vpop.f32.mrb[58].mxu0  ;;  %v3167_v51 = vld [vmem:[#allocation3 + $0x8] sm:$0xff] }
 0x3c1   : > { %v1506_v0 = vadd.f32 %v2828_v26, %v1490_v2  ;;  %v1435_v6 = vpop.f32.mrb[59].mxu0  ;;  %2854 = vmatmul.mubr.bf16.gmra.mrb[52].mxu1 %v1514_v34  ;;  %v4328_v2 = vld [vmem:[#allocation2 + $0xd8] sm:$0xff]  ;;  %v3170_v26 = vld [vmem:[%s3723_s21 + $0x10] sm:$0xff]  }
 0x3c2   : > { %v1504_v43 = vadd.f32 %v1488_v56, %v1435_v6  ;;  %2902 = vmatpush3.bf16.msra.mxu1 %v4302_v60  ;;  %v3165_v56 = vld [vmem:[#allocation3] sm:$0xff]  ;;  %v3173_v6 = vld [vmem:[%s3723_s21 + $0x18] sm:$0xff]  }
 0x3c3   : > { %v1516_v32 = vpack.c.bf16 %v1506_v0, %v1505_v17  ;;  %2903 = vmatprep.subr.bf16.mxu1 %v4309_v28  ;;  %v3166_v17 = vld [vmem:[%s3723_s21] sm:$0xff]  }
 0x3c4   : > { %v1515_v11 = vpack.c.bf16 %v1504_v43, %v1503_v4  ;;  %v3169_v4 = vld [vmem:[%s3723_s21 + $0x8] sm:$0xff]   ;;  %v3172_v0 = vld [vmem:[#allocation3 + $0x20] sm:$0xff] }
 0x3c5   : > { %v3175_v43 = vld [vmem:[#allocation3 + $0x28] sm:$0xff] }
 0x3c6   : > { %v2831_v36 = vpop.f32.mrb[60].mxu0  ;;  %2857 = vmatprep.mubr.bf16.mxu1 %v1515_v11  ;;  %2904 = vmatpush3.bf16.msra.mxu1 %v4309_v28 }
 0x3c7   : > { %v1509_v9 = vadd.f32 %v2831_v36, %v1493_v10  ;;  %v1448_v23 = vpop.f32.mrb[61].mxu0  ;;  %2905 = vmatprep.subr.bf16.mxu1 %v4318_v46  ;;  %v3178_v10 = vld [vmem:[#allocation3 + $0x38] sm:$0xff] }
 0x3c8   : > { %v1507_v31 = vadd.f32 %v1491_v5, %v1448_v23  ;;  %v2832_v39 = vpop.f32.mrb[62].mxu0 }
 0x3c9   : > { %v1510_v53 = vadd.f32 %v2832_v39, %v1494_v49  ;;  %v1451_v34 = vpop.f32.mrb[63].mxu0  ;;  %2858 = vmatmul.mubr.bf16.gmra.mrb[56].mxu1 %v1516_v32  ;;  %v3177_v32 = vld [vmem:[%s3723_s21 + $0x28] sm:$0xff]  }
 0x3ca   : > { %v1508_v57 = vadd.f32 %v1492_v12, %v1451_v34  ;;  %2906 = vmatpush3.bf16.msra.mxu1 %v4318_v46 }
 0x3cb   : > { %v1518_v58 = vpack.c.bf16 %v1510_v53, %v1509_v9  ;;  %2907 = vmatprep.subr.bf16.mxu1 %v4324_v55 }
 0x3cc   : > { %v1517_v14 = vpack.c.bf16 %v1508_v57, %v1507_v31 }
 0x3ce   : > { %2861 = vmatprep.mubr.bf16.mxu1 %v1517_v14  ;;  %2908 = vmatpush3.bf16.msra.mxu1 %v4324_v55 }
 0x3cf   : > { %2909 = vmatprep.subr.bf16.mxu1 %v4328_v2 }
 0x3d1   : > { %2862 = vmatmul.mubr.bf16.gmra.mrb[60].mxu1 %v1518_v58 }
 0x3d2   : > { %2910 = vmatpush3.bf16.msra.mxu1 %v4328_v2  ;;  %2913 = vmatprep.mubr.bf16.mxu1 %v3165_v56 }
 0x3d3   : > { %2911 = vmatprep.subr.bf16.mxu1 %v4332_v16 }
 0x3d6   : > { %2912 = vmatpush3.bf16.msra.mxu1 %v4332_v16 }
 0x3d7   : > { %2961 = vmatprep.subr.bf16.mxu1 %v3166_v17 }
 0x3d9   : > { %2914 = vmatmul.mubr.bf16.vlgmr.msra.gmra.mrb[64].mxu1 %v3167_v51 }
 0x3da   : > { %2917 = vmatprep.mubr.bf16.mxu1 %v3168_v20  ;;  %2962 = vmatpush3.bf16.msra.mxu1 %v3166_v17 }
 0x3db   : > { %2963 = vmatprep.subr.bf16.mxu1 %v3169_v4 }
 0x3de   : > { %2964 = vmatpush3.bf16.msra.mxu1 %v3169_v4 }
 0x3df   : > { %2965 = vmatprep.subr.bf16.mxu1 %v3170_v26 }
 0x3e1   : > { %2918 = vmatmul.mubr.bf16.gmra.mrb[68].mxu1 %v3171_v22 }
 0x3e2   : > { %2921 = vmatprep.mubr.bf16.mxu1 %v3172_v0  ;;  %2966 = vmatpush3.bf16.msra.mxu1 %v3170_v26 }
 0x3e3   : > { %2967 = vmatprep.subr.bf16.mxu1 %v3173_v6 }
 0x3e6   : > { %2968 = vmatpush3.bf16.msra.mxu1 %v3173_v6 }
 0x3e7   : > { %2969 = vmatprep.subr.bf16.mxu1 %v3174_v59 }
 0x3e9   : > { %2922 = vmatmul.mubr.bf16.gmra.mrb[72].mxu1 %v3175_v43 }
 0x3ea   : > { %2925 = vmatprep.mubr.bf16.mxu1 %v3176_v40  ;;  %2970 = vmatpush3.bf16.msra.mxu1 %v3174_v59 }
 0x3eb   : > { %2971 = vmatprep.subr.bf16.mxu1 %v3177_v32 }
 0x3ee   : > { %2972 = vmatpush3.bf16.msra.mxu1 %v3177_v32 }
 0x3ef   : > { %2973 = vmatprep.subr.bf16.mxu1 %v4013_v37 }
 0x3f1   : > { %2926 = vmatmul.mubr.bf16.gmra.mrb[76].mxu1 %v3178_v10 }
 0x3f2   : > { %2974 = vmatpush3.bf16.msra.mxu1 %v4013_v37 }
 0x3f3   : > { %2975 = vmatprep.subr.bf16.mxu1 %v4020_v38 }
 0x3f6   : > { %2976 = vmatpush3.bf16.msra.mxu1 %v4020_v38 }
 0x46c   : > { %v2787_v11 = vpop.f32.mrb[32].mxu1 }
 0x46d   : > { %v1263_v5 = vpop.f32.mrb[33].mxu1  ;;  %v4348_v36 = vadd.f32 %v2787_v11, %v4152_v15 }
 0x46e   : > { %v2788_v49 = vpop.f32.mrb[34].mxu1  ;;  %v4354_v23 = vadd.f32 %v4152_v15, %v1263_v5 }
 0x46f   : > { %v4351_v12 = vadd.f32 %v2788_v49, %v4152_v15  ;;  %v1266_v9 = vpop.f32.mrb[35].mxu1 }
 0x470   : > { %v4357_v31 = vadd.f32 %v4152_v15, %v1266_v9 }
 0x471   : > { %v1327_v37 = vpack.c.bf16 %v4351_v12, %v4348_v36 }
 0x472   : > { %v1326_v38 = vpack.c.bf16 %v4357_v31, %v4354_v23 }
 0x473   : > { %1335 = vst [vmem:[#allocation2 + $0x28] sm:$0xff] %v1327_v37 }
 0x474   : > { %1334 = vst [vmem:[#allocation2 + $0x8] sm:$0xff] %v1326_v38  ;;  %v2791_v39 = vpop.f32.mrb[36].mxu1 }
 0x475   : > { %v1279_v53 = vpop.f32.mrb[37].mxu1  ;;  %v4364_v57 = vadd.f32 %v2791_v39, %v4152_v15 }
 0x476   : > { %v2792_v34 = vpop.f32.mrb[38].mxu1  ;;  %v4370_v56 = vadd.f32 %v4152_v15, %v1279_v53 }
 0x477   : > { %v4367_v58 = vadd.f32 %v2792_v34, %v4152_v15  ;;  %v1282_v14 = vpop.f32.mrb[39].mxu1 }
 0x478   : > { %v4373_v17 = vadd.f32 %v4152_v15, %v1282_v14 }
 0x479   : > { %v1329_v51 = vpack.c.bf16 %v4367_v58, %v4364_v57 }
 0x47a   : > { %v1328_v20 = vpack.c.bf16 %v4373_v17, %v4370_v56 }
 0x47b   : > { %1337 = vst [vmem:[#allocation2 + $0x68] sm:$0xff] %v1329_v51 }
 0x47c   : > { %1336 = vst [vmem:[#allocation2 + $0x48] sm:$0xff] %v1328_v20  ;;  %v2795_v4 = vpop.f32.mrb[40].mxu1  ;;  %v4412_v20 = vld [vmem:[%s3738_s13] ss:$0 sm:$0xff] }
 0x47d   : > { %v1295_v26 = vpop.f32.mrb[41].mxu1  ;;  %v4380_v0 = vadd.f32 %v2795_v4, %v4152_v15 }
 0x47e   : > { %v2796_v22 = vpop.f32.mrb[42].mxu1  ;;  %v4386_v43 = vadd.f32 %v4152_v15, %v1295_v26 }
 0x47f   : > { %v4383_v6 = vadd.f32 %v2796_v22, %v4152_v15  ;;  %v1298_v59 = vpop.f32.mrb[43].mxu1 }
 0x480   : > { %v4389_v40 = vadd.f32 %v4152_v15, %v1298_v59 }
 0x481   : > { %v1331_v32 = vpack.c.bf16 %v4383_v6, %v4380_v0 }
 0x482   : > { %v1330_v10 = vpack.c.bf16 %v4389_v40, %v4386_v43 }
 0x483   : > { %1339 = vst [vmem:[#allocation2 + $0xa8] sm:$0xff] %v1331_v32 }
 0x484   : > { %1338 = vst [vmem:[#allocation2 + $0x88] sm:$0xff] %v1330_v10  ;;  %v2799_v11 = vpop.f32.mrb[44].mxu1 }
 0x485   : > { %v1311_v5 = vpop.f32.mrb[45].mxu1  ;;  %v4396_v9 = vadd.f32 %v2799_v11, %v4152_v15 }
 0x486   : > { %v2800_v49 = vpop.f32.mrb[46].mxu1  ;;  %v4402_v39 = vadd.f32 %v4152_v15, %v1311_v5 }
 0x487   : > { %v4399_v37 = vadd.f32 %v2800_v49, %v4152_v15  ;;  %v1314_v38 = vpop.f32.mrb[47].mxu1 }
 0x488   : > { %4766 = vst [vmem:[#allocation37_spill] sm:$0xff] %v4402_v39  ;;  %v4405_v53 = vadd.f32 %v4152_v15, %v1314_v38 }
 0x489   : > { %4765 = vst [vmem:[#allocation36_spill] sm:$0xff] %v4399_v37  ;;  %v1333_v34 = vpack.c.bf16 %v4399_v37, %v4396_v9 }
 0x48a   : > { %4767 = vst [vmem:[#allocation38_spill] sm:$0xff] %v4405_v53  ;;  %v1332_v14 = vpack.c.bf16 %v4405_v53, %v4402_v39 }
 0x48b   : > { %1341 = vst [vmem:[#allocation2 + $0xe8] sm:$0xff] %v1333_v34 }
 0x48c   : > { %1340 = vst [vmem:[#allocation2 + $0xc8] sm:$0xff] %v1332_v14  ;;  %v2851_v51 = vpop.f32.mrb[48].mxu1 }
 0x48d   : > { %v1562_v4 = vadd.f32 %v4412_v20, %v2851_v51  ;;  %v1553_v26 = vpop.f32.mrb[49].mxu1 }
 0x48e   : > { %v1554_v22 = vadd.f32 %v4412_v20, %v1553_v26  ;;  %v2852_v59 = vpop.f32.mrb[50].mxu1 }
 0x48f   : > { %v1565_v32 = vadd.f32 %v4412_v20, %v2852_v59  ;;  %v1556_v10 = vpop.f32.mrb[51].mxu1  ;;  %v1618_v5 = vmax.f32 %v1562_v4, 0.0 }
 0x490   : > { %v1557_v11 = vadd.f32 %v4412_v20, %v1556_v10  ;;  %v1616_v38 = vmax.f32 %v1554_v22, 0.0 }
 0x491   : > { %v1619_v49 = vmax.f32 %v1565_v32, 0.0 }
 0x492   : > { %v1617_v53 = vmax.f32 %v1557_v11, 0.0 }
 0x493   : > { %v1633_v34 = vpack.c.bf16 %v1619_v49, %v1618_v5 }
 0x494   : > { %v1632_v14 = vpack.c.bf16 %v1617_v53, %v1616_v38  ;;  %v2855_v54 = vpop.f32.mrb[52].mxu1 }
 0x495   : > { %v1578_v37 = vadd.f32 %v4412_v20, %v2855_v54  ;;  %v1569_v48 = vpop.f32.mrb[53].mxu1 }
 0x496   : > { %v1570_v51 = vadd.f32 %v4412_v20, %v1569_v48  ;;  %v2856_v39 = vpop.f32.mrb[54].mxu1  ;;  %2881 = vmatprep.mubr.bf16.mxu0 %v1632_v14 }
 0x497   : > { %v1581_v26 = vadd.f32 %v4412_v20, %v2856_v39  ;;  %v1572_v59 = vpop.f32.mrb[55].mxu1  ;;  %2882 = vmatmul.mubr.bf16.vlgmr.msra.gmra.mrb[64].mxu0 %v1633_v34  ;;  %v1622_v4 = vmax.f32 %v1578_v37, 0.0 }
 0x498   : > { %v1573_v10 = vadd.f32 %v4412_v20, %v1572_v59  ;;  %2930 = vmatpush3.bf16.msra.mxu0 %v4227_v61  ;;  %v1620_v53 = vmax.f32 %v1570_v51, 0.0 }
 0x499   : > { %v1623_v22 = vmax.f32 %v1581_v26, 0.0  ;;  %2931 = vmatprep.subr.bf16.mxu0 %v4231_v44 }
 0x49a   : > { %v1621_v32 = vmax.f32 %v1573_v10, 0.0 }
 0x49b   : > { %v1635_v54 = vpack.c.bf16 %v1623_v22, %v1622_v4 }
 0x49c   : > { %v1634_v11 = vpack.c.bf16 %v1621_v32, %v1620_v53  ;;  %2932 = vmatpush3.bf16.msra.mxu0 %v4231_v44  ;;  %v2859_v48 = vpop.f32.mrb[56].mxu1  ;;  %v1876_v32 = vunpack.c.l.bf16 %v4293_v42 }
 0x49d   : > { %v1594_v5 = vadd.f32 %v4412_v20, %v2859_v48  ;;  %v1585_v39 = vpop.f32.mrb[57].mxu1  ;;  %2933 = vmatprep.subr.bf16.mxu0 %v4237_v7 }
 0x49e   : > { %v1586_v49 = vadd.f32 %v4412_v20, %v1585_v39  ;;  %v2860_v38 = vpop.f32.mrb[58].mxu1  ;;  %2885 = vmatprep.mubr.bf16.mxu0 %v1634_v11  ;;  %v1874_v11 = vunpack.c.l.bf16 %v4286_v35 }
 0x49f   : > { %v1597_v61 = vadd.f32 %v4412_v20, %v2860_v38  ;;  %v1588_v37 = vpop.f32.mrb[59].mxu1  ;;  %2886 = vmatmul.mubr.bf16.gmra.mrb[68].mxu0 %v1635_v54  ;;  %v1626_v14 = vmax.f32 %v1594_v5, 0.0 }
 0x4a0   : > { %v1589_v34 = vadd.f32 %v4412_v20, %v1588_v37  ;;  %2934 = vmatpush3.bf16.msra.mxu0 %v4237_v7  ;;  %v1624_v51 = vmax.f32 %v1586_v49, 0.0  ;;  %v1875_v49 = vunpack.c.h.bf16 %v4286_v35  ;;  %v1892_v37 = vmul.f32 %v1876_v32, %v3931_v33 }
 0x4a1   : > { %v1627_v44 = vmax.f32 %v1597_v61, 0.0  ;;  %2935 = vmatprep.subr.bf16.mxu0 %v4245_v62  ;;  %v1878_v32 = vunpack.c.l.bf16 %v4302_v60 }
 0x4a2   : > { %v1625_v26 = vmax.f32 %v1589_v34, 0.0 }
 0x4a3   : > { %v1637_v59 = vpack.c.bf16 %v1627_v44, %v1626_v14  ;;  %v1890_v44 = vmul.f32 %v1874_v11, %v3931_v33  ;;  %v1881_v11 = vunpack.c.h.bf16 %v4309_v28 }
 0x4a4   : > { %v1636_v10 = vpack.c.bf16 %v1625_v26, %v1624_v51  ;;  %2936 = vmatpush3.bf16.msra.mxu0 %v4245_v62  ;;  %v2863_v4 = vpop.f32.mrb[60].mxu1  ;;  %v1877_v62 = vunpack.c.h.bf16 %v4293_v42 }
 0x4a5   : > { %v1610_v22 = vadd.f32 %v4412_v20, %v2863_v4  ;;  %v1601_v53 = vpop.f32.mrb[61].mxu1  ;;  %2937 = vmatprep.subr.bf16.mxu0 %v4258_v45  ;;  %v1880_v4 = vunpack.c.l.bf16 %v4309_v28 }
 0x4a6   : > { %v1602_v7 = vadd.f32 %v4412_v20, %v1601_v53  ;;  %v2864_v54 = vpop.f32.mrb[62].mxu1  ;;  %2889 = vmatprep.mubr.bf16.mxu0 %v1636_v10  ;;  %v1893_v26 = vmul.f32 %v1877_v62, %v3931_v33 }
 0x4a7   : > { %v1613_v48 = vadd.f32 %v4412_v20, %v2864_v54  ;;  %v1604_v5 = vpop.f32.mrb[63].mxu1  ;;  %2890 = vmatmul.mubr.bf16.gmra.mrb[72].mxu0 %v1637_v59  ;;  %v1630_v38 = vmax.f32 %v1610_v22, 0.0  ;;  %v1896_v62 = vmul.f32 %v1880_v4, %v3931_v33 }
 0x4a8   : > { %v1605_v39 = vadd.f32 %v4412_v20, %v1604_v5  ;;  %2938 = vmatpush3.bf16.msra.mxu0 %v4258_v45  ;;  %v1628_v34 = vmax.f32 %v1602_v7, 0.0  ;;  %v1891_v45 = vmul.f32 %v1875_v49, %v3931_v33  ;;  %v1894_v49 = vmul.f32 %v1878_v32, %v3931_v33 }
 0x4a9   : > { %v1631_v61 = vmax.f32 %v1613_v48, 0.0  ;;  %2939 = vmatprep.subr.bf16.mxu0 %v4263_v13  ;;  %v1879_v48 = vunpack.c.h.bf16 %v4302_v60  ;;  %v1884_v60 = vunpack.c.l.bf16 %v4324_v55 }
 0x4aa   : > { %v1629_v14 = vmax.f32 %v1605_v39, 0.0 }
 0x4ab   : > { %v1639_v51 = vpack.c.bf16 %v1631_v61, %v1630_v38  ;;  %v1897_v38 = vmul.f32 %v1881_v11, %v3931_v33  ;;  %v1895_v28 = vmul.f32 %v1879_v48, %v3931_v33  ;;  %v1888_v11 = vunpack.c.l.bf16 %v4332_v16 }
 0x4ac   : > { %v1638_v42 = vpack.c.bf16 %v1629_v14, %v1628_v34  ;;  %2940 = vmatpush3.bf16.msra.mxu0 %v4263_v13  ;;  %v2915_v59 = vpop.f32.mrb[64].mxu1 }
 0x4ad   : > { %v1908_v35 = vadd.f32 %v2915_v59, %v1892_v37  ;;  %v1811_v10 = vpop.f32.mrb[65].mxu1  ;;  %2941 = vmatprep.subr.bf16.mxu0 %v4276_v27 }
 0x4ae   : > { %v1906_v22 = vadd.f32 %v1890_v44, %v1811_v10  ;;  %2893 = vmatprep.mubr.bf16.mxu0 %v1638_v42  ;;  %v2916_v53 = vpop.f32.mrb[66].mxu1  ;;  %v1882_v44 = vunpack.c.l.bf16 %v4318_v46  ;;  %v1885_v42 = vunpack.c.h.bf16 %v4324_v55 }
 0x4af   : > { %v1909_v7 = vadd.f32 %v2916_v53, %v1893_v26  ;;  %2894 = vmatmul.mubr.bf16.gmra.mrb[76].mxu0 %v1639_v51  ;;  %v1814_v54 = vpop.f32.mrb[67].mxu1 }
 0x4b0   : > { %v1907_v13 = vadd.f32 %v1891_v45, %v1814_v54  ;;  %2942 = vmatpush3.bf16.msra.mxu0 %v4276_v27  ;;  %v1898_v4 = vmul.f32 %v1882_v44, %v3931_v33 }
 0x4b1   : > { %v1923_v5 = vpack.c.bf16 %v1909_v7, %v1908_v35  ;;  %2943 = vmatprep.subr.bf16.mxu0 %v4281_v29  ;;  %v1900_v35 = vmul.f32 %v1884_v60, %v3931_v33 }
 0x4b2   : > { %v1922_v39 = vpack.c.bf16 %v1907_v13, %v1906_v22  ;;  %v1901_v22 = vmul.f32 %v1885_v42, %v3931_v33 }
 0x4b4   : > { %2944 = vmatpush3.bf16.msra.mxu0 %v4281_v29  ;;  %v2919_v61 = vpop.f32.mrb[68].mxu1  ;;  %2945 = vmatprep.mubr.bf16.mxu0 %v1922_v39  ;;  %v1883_v29 = vunpack.c.h.bf16 %v4318_v46  ;;  %v1886_v46 = vunpack.c.l.bf16 %v4328_v2 }
 0x4b5   : > { %v1912_v37 = vadd.f32 %v2919_v61, %v1896_v62  ;;  %v1827_v27 = vpop.f32.mrb[69].mxu1  ;;  %v1889_v62 = vunpack.c.h.bf16 %v4332_v16  ;;  %v1904_v61 = vmul.f32 %v1888_v11, %v3931_v33 }
 0x4b6   : > { %v1910_v34 = vadd.f32 %v1894_v49, %v1827_v27  ;;  %v2920_v14 = vpop.f32.mrb[70].mxu1  ;;  %v1899_v32 = vmul.f32 %v1883_v29, %v3931_v33  ;;  %v1887_v49 = vunpack.c.h.bf16 %v4328_v2 }
 0x4b7   : > { %v1913_v51 = vadd.f32 %v2920_v14, %v1897_v38  ;;  %v1830_v26 = vpop.f32.mrb[71].mxu1  ;;  %2946 = vmatmul.mubr.bf16.vlgmr.msra.gmra.mrb[80].mxu0 %v1923_v5  ;;  %v1905_v27 = vmul.f32 %v1889_v62, %v3931_v33 }
 0x4b8   : > { %v1911_v59 = vadd.f32 %v1895_v28, %v1830_v26 }
 0x4b9   : > { %v1925_v45 = vpack.c.bf16 %v1913_v51, %v1912_v37  ;;  %v1902_v37 = vmul.f32 %v1886_v46, %v3931_v33 }
 0x4ba   : > { %v1924_v10 = vpack.c.bf16 %v1911_v59, %v1910_v34  ;;  %v1903_v34 = vmul.f32 %v1887_v49, %v3931_v33  ;;  %v1342_v33 = vadd.f32 %v4354_v23, %v4161_v21 }
 0x4bc   : > { %v2923_v53 = vpop.f32.mrb[72].mxu1  ;;  %2949 = vmatprep.mubr.bf16.mxu0 %v1924_v10 }
 0x4bd   : > { %v1916_v7 = vadd.f32 %v2923_v53, %v1900_v35  ;;  %v1843_v54 = vpop.f32.mrb[73].mxu1  ;;  %v1344_v35 = vadd.f32 %v4348_v36, %v4155_v18  ;;  %v1343_v18 = vadd.f32 %v4357_v31, %v4164_v25  ;;  %v1346_v25 = vadd.f32 %v4370_v56, %v4177_v1 }
 0x4be   : > { %v1914_v55 = vadd.f32 %v1898_v4, %v1843_v54  ;;  %v2924_v13 = vpop.f32.mrb[74].mxu1 }
 0x4bf   : > { %v1917_v48 = vadd.f32 %v2924_v13, %v1901_v22  ;;  %v1846_v5 = vpop.f32.mrb[75].mxu1  ;;  %2950 = vmatmul.mubr.bf16.gmra.mrb[84].mxu0 %v1925_v45 }
 0x4c0   : > { %v1915_v39 = vadd.f32 %v1899_v32, %v1846_v5  ;;  %v1345_v32 = vadd.f32 %v4351_v12, %v4158_v19  ;;  %v1348_v12 = vadd.f32 %v4364_v57, %v4171_v30  ;;  %v1347_v30 = vadd.f32 %v4373_v17, %v4180_v3 }
 0x4c1   : > { %v1927_v38 = vpack.c.bf16 %v1917_v48, %v1916_v7  ;;  %v1350_v17 = vadd.f32 %v4386_v43, %v4193_v41 }
 0x4c2   : > { %v1926_v28 = vpack.c.bf16 %v1915_v39, %v1914_v55  ;;  %v1349_v39 = vadd.f32 %v4367_v58, %v4174_v63  ;;  %v1352_v58 = vadd.f32 %v4380_v0, %v4187_v52  ;;  %v1351_v52 = vadd.f32 %v4389_v40, %v4196_v8  ;;  %v4768_v40 = vld [vmem:[#allocation37_spill] sm:$0xff] }
 0x4c4   : > { %v2927_v60 = vpop.f32.mrb[76].mxu1  ;;  %2953 = vmatprep.mubr.bf16.mxu0 %v1926_v28 }
 0x4c5   : > { %v1920_v14 = vadd.f32 %v2927_v60, %v1904_v61  ;;  %v1859_v44 = vpop.f32.mrb[77].mxu1 }
 0x4c6   : > { %v1918_v51 = vadd.f32 %v1902_v37, %v1859_v44  ;;  %v2928_v26 = vpop.f32.mrb[78].mxu1  ;;  %v1353_v44 = vadd.f32 %v4383_v6, %v4190_v24 }
 0x4c7   : > { %v1921_v16 = vadd.f32 %v2928_v26, %v1905_v27  ;;  %v1862_v42 = vpop.f32.mrb[79].mxu1  ;;  %2954 = vmatmul.mubr.bf16.gmra.mrb[88].mxu0 %v1927_v38 }
 0x4c8   : > { %v1919_v2 = vadd.f32 %v1903_v34, %v1862_v42  ;;  %v4533_v42 = vld [vmem:[%s3743_s23] ss:$0 sm:$0xff] }
 0x4c9   : > { %v1929_v59 = vpack.c.bf16 %v1921_v16, %v1920_v14 }
 0x4ca   : > { %v1928_v29 = vpack.c.bf16 %v1919_v2, %v1918_v51 }
 0x4cc   : > { %2957 = vmatprep.mubr.bf16.mxu0 %v1928_v29 }
 0x4cf   : > { %2958 = vmatmul.mubr.bf16.gmra.mrb[92].mxu0 %v1929_v59 }
 0x56a   : > { %v2883_v45 = vpop.f32.mrb[64].mxu0 }
 0x56b   : > { %v1683_v10 = vadd.f32 %v2883_v45, %v4152_v15  ;;  %v1674_v4 = vpop.f32.mrb[65].mxu0  ;;  %v1354_v45 = vadd.f32 %v4768_v40, %v4209_v50 }
 0x56c   : > { %v1675_v22 = vadd.f32 %v4152_v15, %v1674_v4  ;;  %v2884_v53 = vpop.f32.mrb[66].mxu0  ;;  %v4769_v4 = vld [vmem:[#allocation34_spill] sm:$0xff] }
 0x56d   : > { %v4485_v7 = vadd.f32 %v1683_v10, %v1344_v35  ;;  %v1686_v54 = vadd.f32 %v2884_v53, %v4152_v15  ;;  %v1677_v11 = vpop.f32.mrb[67].mxu0 }
 0x56e   : > { %v4490_v36 = vadd.f32 %v1675_v22, %v1342_v33  ;;  %v1678_v55 = vadd.f32 %v4152_v15, %v1677_v11  ;;  %v4770_v33 = vld [vmem:[#allocation36_spill] sm:$0xff]  ;;  %v4771_v11 = vld [vmem:[#allocation35_spill] sm:$0xff] }
 0x56f   : > { %v1738_v13 = vpack.c.bf16 %v1686_v54, %v1683_v10  ;;  %v4493_v21 = vadd.f32 %v1686_v54, %v1345_v32 }
 0x570   : > { %v1737_v23 = vpack.c.bf16 %v1678_v55, %v1675_v22  ;;  %v4495_v46 = vadd.f32 %v1678_v55, %v1343_v18  ;;  %v1357_v22 = vadd.f32 %v4770_v33, %v4769_v4  ;;  %v4772_v18 = vld [vmem:[#allocation38_spill] sm:$0xff] }
 0x571   : > { %1746 = vst [vmem:[#allocation2 + $0x30] sm:$0xff] %v1738_v13 }
 0x572   : > { %1745 = vst [vmem:[#allocation2 + $0x10] sm:$0xff] %v1737_v23  ;;  %v2887_v19 = vpop.f32.mrb[68].mxu0 }
 0x573   : > { %v1699_v48 = vadd.f32 %v2887_v19, %v4152_v15  ;;  %v1690_v5 = vpop.f32.mrb[69].mxu0 }
 0x574   : > { %v1691_v31 = vadd.f32 %v4152_v15, %v1690_v5  ;;  %v2888_v62 = vpop.f32.mrb[70].mxu0 }
 0x575   : > { %v4505_v49 = vadd.f32 %v1699_v48, %v1348_v12  ;;  %v1702_v38 = vadd.f32 %v2888_v62, %v4152_v15  ;;  %v1693_v61 = vpop.f32.mrb[71].mxu0 }
 0x576   : > { %v4510_v57 = vadd.f32 %v1691_v31, %v1346_v25  ;;  %v1694_v28 = vadd.f32 %v4152_v15, %v1693_v61 }
 0x577   : > { %v1740_v37 = vpack.c.bf16 %v1702_v38, %v1699_v48  ;;  %v4513_v1 = vadd.f32 %v1702_v38, %v1349_v39 }
 0x578   : > { %v1739_v56 = vpack.c.bf16 %v1694_v28, %v1691_v31  ;;  %v4515_v27 = vadd.f32 %v1694_v28, %v1347_v30 }
 0x579   : > { %1748 = vst [vmem:[#allocation2 + $0x70] sm:$0xff] %v1740_v37 }
 0x57a   : > { %1747 = vst [vmem:[#allocation2 + $0x50] sm:$0xff] %v1739_v56  ;;  %v2891_v63 = vpop.f32.mrb[72].mxu0 }
 0x57b   : > { %v1715_v60 = vadd.f32 %v2891_v63, %v4152_v15  ;;  %v1706_v3 = vpop.f32.mrb[73].mxu0 }
 0x57c   : > { %v1707_v34 = vadd.f32 %v4152_v15, %v1706_v3  ;;  %v2892_v14 = vpop.f32.mrb[74].mxu0 }
 0x57d   : > { %v4525_v51 = vadd.f32 %v1715_v60, %v1352_v58  ;;  %v1718_v26 = vadd.f32 %v2892_v14, %v4152_v15  ;;  %v1709_v16 = vpop.f32.mrb[75].mxu0  ;;  %v1356_v15 = vadd.f32 %v4396_v9, %v4203_v47  ;;  %v1355_v47 = vadd.f32 %v4772_v18, %v4771_v11 }
 0x57e   : > { %v4530_v0 = vadd.f32 %v1707_v34, %v1350_v17  ;;  %v1710_v41 = vadd.f32 %v4533_v42, %v1709_v16 }
 0x57f   : > { %v1742_v43 = vpack.c.bf16 %v1718_v26, %v1715_v60  ;;  %v4536_v2 = vadd.f32 %v1718_v26, %v1353_v44 }
 0x580   : > { %v1741_v59 = vpack.c.bf16 %v1710_v41, %v1707_v34  ;;  %v4538_v29 = vadd.f32 %v1710_v41, %v1351_v52 }
 0x581   : > { %1750 = vst [vmem:[#allocation2 + $0xb0] sm:$0xff] %v1742_v43 }
 0x582   : > { %1749 = vst [vmem:[#allocation2 + $0x90] sm:$0xff] %v1741_v59  ;;  %v2895_v24 = vpop.f32.mrb[76].mxu0 }
 0x583   : > { %v1731_v8 = vadd.f32 %v4533_v42, %v2895_v24  ;;  %v1722_v6 = vpop.f32.mrb[77].mxu0 }
 0x584   : > { %v1723_v35 = vadd.f32 %v4533_v42, %v1722_v6  ;;  %v2896_v10 = vpop.f32.mrb[78].mxu0 }
 0x585   : > { %v4548_v53 = vadd.f32 %v1731_v8, %v1356_v15  ;;  %v1734_v32 = vadd.f32 %v4533_v42, %v2896_v10  ;;  %v1725_v54 = vpop.f32.mrb[79].mxu0 }
 0x586   : > { %v4553_v9 = vadd.f32 %v1723_v35, %v1354_v45  ;;  %v1726_v55 = vadd.f32 %v4533_v42, %v1725_v54 }
 0x587   : > { %v1744_v13 = vpack.c.bf16 %v1734_v32, %v1731_v8  ;;  %v4556_v50 = vadd.f32 %v1734_v32, %v1357_v22 }
 0x588   : > { %v1743_v23 = vpack.c.bf16 %v1726_v55, %v1723_v35  ;;  %v4558_v19 = vadd.f32 %v1726_v55, %v1355_v47 }
 0x589   : > { %1752 = vst [vmem:[#allocation2 + $0xf0] sm:$0xff] %v1744_v13 }
 0x58a   : > { %1751 = vst [vmem:[#allocation2 + $0xd0] sm:$0xff] %v1743_v23  ;;  %v2947_v12 = vpop.f32.mrb[80].mxu0 }
 0x58b   : > { %v1973_v48 = vadd.f32 %v4412_v20, %v2947_v12  ;;  %v1964_v5 = vpop.f32.mrb[81].mxu0 }
 0x58c   : > { %v1965_v25 = vadd.f32 %v4412_v20, %v1964_v5  ;;  %v2948_v31 = vpop.f32.mrb[82].mxu0 }
 0x58d   : > { %v1976_v62 = vadd.f32 %v4412_v20, %v2948_v31  ;;  %v1967_v39 = vpop.f32.mrb[83].mxu0  ;;  %v2029_v61 = vmax.f32 %v1973_v48, 0.0 }
 0x58e   : > { %v1968_v38 = vadd.f32 %v4412_v20, %v1967_v39  ;;  %v2027_v28 = vmax.f32 %v1965_v25, 0.0 }
 0x58f   : > { %v2030_v30 = vmax.f32 %v1976_v62, 0.0 }
 0x590   : > { %v2028_v37 = vmax.f32 %v1968_v38, 0.0 }
 0x591   : > { %v2044_v56 = vpack.c.bf16 %v2030_v30, %v2029_v61 }
 0x592   : > { %v2043_v63 = vpack.c.bf16 %v2028_v37, %v2027_v28  ;;  %v2951_v58 = vpop.f32.mrb[84].mxu0 }
 0x593   : > { %v1989_v60 = vadd.f32 %v4412_v20, %v2951_v58  ;;  %v1980_v3 = vpop.f32.mrb[85].mxu0 }
 0x594   : > { %v1981_v17 = vadd.f32 %v4412_v20, %v1980_v3  ;;  %v2952_v34 = vpop.f32.mrb[86].mxu0  ;;  %2977 = vmatprep.mubr.bf16.mxu1 %v2043_v63 }
 0x595   : > { %v1992_v14 = vadd.f32 %v4412_v20, %v2952_v34  ;;  %v1983_v44 = vpop.f32.mrb[87].mxu0  ;;  %2978 = vmatmul.mubr.bf16.vlgmr.msra.gmra.mrb[80].mxu1 %v2044_v56  ;;  %v2033_v16 = vmax.f32 %v1989_v60, 0.0 }
 0x596   : > { %v1984_v26 = vadd.f32 %v4412_v20, %v1983_v44  ;;  %v2031_v41 = vmax.f32 %v1981_v17, 0.0 }
 0x597   : > { %v2034_v52 = vmax.f32 %v1992_v14, 0.0 }
 0x598   : > { %v2032_v43 = vmax.f32 %v1984_v26, 0.0 }
 0x599   : > { %v2046_v59 = vpack.c.bf16 %v2034_v52, %v2033_v16 }
 0x59a   : > { %v2045_v24 = vpack.c.bf16 %v2032_v43, %v2031_v41  ;;  %v2955_v15 = vpop.f32.mrb[88].mxu0 }
 0x59b   : > { %v2005_v8 = vadd.f32 %v4412_v20, %v2955_v15  ;;  %v1996_v6 = vpop.f32.mrb[89].mxu0 }
 0x59c   : > { %v1997_v40 = vadd.f32 %v4412_v20, %v1996_v6  ;;  %v2956_v45 = vpop.f32.mrb[90].mxu0  ;;  %2981 = vmatprep.mubr.bf16.mxu1 %v2045_v24 }
 0x59d   : > { %v2008_v35 = vadd.f32 %v4412_v20, %v2956_v45  ;;  %v1999_v10 = vpop.f32.mrb[91].mxu0  ;;  %2982 = vmatmul.mubr.bf16.gmra.mrb[84].mxu1 %v2046_v59  ;;  %v2037_v33 = vmax.f32 %v2005_v8, 0.0 }
 0x59e   : > { %v2000_v4 = vadd.f32 %v4412_v20, %v1999_v10  ;;  %v2035_v32 = vmax.f32 %v1997_v40, 0.0 }
 0x59f   : > { %v2038_v22 = vmax.f32 %v2008_v35, 0.0 }
 0x5a0   : > { %v2036_v54 = vmax.f32 %v2000_v4, 0.0 }
 0x5a1   : > { %v2048_v11 = vpack.c.bf16 %v2038_v22, %v2037_v33 }
 0x5a2   : > { %v2047_v18 = vpack.c.bf16 %v2036_v54, %v2035_v32  ;;  %v2959_v47 = vpop.f32.mrb[92].mxu0 }
 0x5a3   : > { %v2021_v55 = vadd.f32 %v4412_v20, %v2959_v47  ;;  %v2012_v13 = vpop.f32.mrb[93].mxu0 }
 0x5a4   : > { %v2013_v23 = vadd.f32 %v4412_v20, %v2012_v13  ;;  %v2960_v12 = vpop.f32.mrb[94].mxu0  ;;  %2985 = vmatprep.mubr.bf16.mxu1 %v2047_v18 }
 0x5a5   : > { %v2024_v48 = vadd.f32 %v4412_v20, %v2960_v12  ;;  %v2015_v5 = vpop.f32.mrb[95].mxu0  ;;  %2986 = vmatmul.mubr.bf16.gmra.mrb[88].mxu1 %v2048_v11  ;;  %v2041_v31 = vmax.f32 %v2021_v55, 0.0 }
 0x5a6   : > { %v2016_v25 = vadd.f32 %v4412_v20, %v2015_v5  ;;  %v2039_v39 = vmax.f32 %v2013_v23, 0.0 }
 0x5a7   : > { %v2042_v62 = vmax.f32 %v2024_v48, 0.0 }
 0x5a8   : > { %v2040_v38 = vmax.f32 %v2016_v25, 0.0 }
 0x5a9   : > { %v2050_v61 = vpack.c.bf16 %v2042_v62, %v2041_v31 }
 0x5aa   : > { %v2049_v30 = vpack.c.bf16 %v2040_v38, %v2039_v39 }
 0x5ac   : > { %2989 = vmatprep.mubr.bf16.mxu1 %v2049_v30 }
 0x5ad   : > { %2990 = vmatmul.mubr.bf16.gmra.mrb[92].mxu1 %v2050_v61 }
 0x668   : > { %v2979_v28 = vpop.f32.mrb[80].mxu1 }
 0x669   : > { %v2094_v37 = vadd.f32 %v4533_v42, %v2979_v28  ;;  %v2085_v56 = vpop.f32.mrb[81].mxu1 }
 0x66a   : > { %v2086_v63 = vadd.f32 %v4533_v42, %v2085_v56  ;;  %v2980_v58 = vpop.f32.mrb[82].mxu1 }
 0x66b   : > { %v2166_v60 = vadd.f32 %v2094_v37, %v4485_v7  ;;  %v2097_v3 = vadd.f32 %v4533_v42, %v2980_v58  ;;  %v2088_v20 = vpop.f32.mrb[83].mxu1 }
 0x66c   : > { %v2164_v17 = vadd.f32 %v2086_v63, %v4490_v36  ;;  %v2089_v34 = vadd.f32 %v4533_v42, %v2088_v20 }
 0x66d   : > { %v2149_v14 = vpack.c.bf16 %v2097_v3, %v2094_v37  ;;  %v2167_v44 = vadd.f32 %v2097_v3, %v4493_v21  ;;  %2186 = vst [vmem:[%s3745_s3 + $0x10] sm:$0xff] (!%p2405_p6), %v2166_v60 }
 0x66e   : > { %v2148_v26 = vpack.c.bf16 %v2089_v34, %v2086_v63  ;;  %v2165_v16 = vadd.f32 %v2089_v34, %v4495_v46  ;;  %2184 = vst [vmem:[%s3745_s3] sm:$0xff] (!%p2405_p6), %v2164_v17 }
 0x66f   : > { %2157 = vst [vmem:[#allocation2 + $0x38] sm:$0xff] %v2149_v14  ;;  %2187 = vst [vmem:[%s3745_s3 + $0x18] sm:$0xff] (!%p2405_p6), %v2167_v44 }
 0x670   : > { %2156 = vst [vmem:[#allocation2 + $0x18] sm:$0xff] %v2148_v26  ;;  %v2983_v52 = vpop.f32.mrb[84].mxu1  ;;  %2185 = vst [vmem:[%s3745_s3 + $0x8] sm:$0xff] (!%p2405_p6), %v2165_v16 }
 0x671   : > { %v2110_v41 = vadd.f32 %v4533_v42, %v2983_v52  ;;  %v2101_v43 = vpop.f32.mrb[85].mxu1 }
 0x672   : > { %v2102_v7 = vadd.f32 %v4533_v42, %v2101_v43  ;;  %v2984_v59 = vpop.f32.mrb[86].mxu1 }
 0x673   : > { %v2170_v24 = vadd.f32 %v2110_v41, %v4505_v49  ;;  %v2113_v36 = vadd.f32 %v4533_v42, %v2984_v59  ;;  %v2104_v15 = vpop.f32.mrb[87].mxu1 }
 0x674   : > { %v2168_v8 = vadd.f32 %v2102_v7, %v4510_v57  ;;  %v2105_v21 = vadd.f32 %v4533_v42, %v2104_v15 }
 0x675   : > { %v2151_v6 = vpack.c.bf16 %v2113_v36, %v2110_v41  ;;  %v2171_v46 = vadd.f32 %v2113_v36, %v4513_v1  ;;  %2190 = vst [vmem:[%s3745_s3 + $0x30] sm:$0xff] (!%p2405_p6), %v2170_v24 }
 0x676   : > { %v2150_v40 = vpack.c.bf16 %v2105_v21, %v2102_v7  ;;  %v2169_v45 = vadd.f32 %v2105_v21, %v4515_v27  ;;  %2188 = vst [vmem:[%s3745_s3 + $0x20] sm:$0xff] (!%p2405_p6), %v2168_v8 }
 0x677   : > { %2159 = vst [vmem:[#allocation2 + $0x78] sm:$0xff] %v2151_v6  ;;  %2191 = vst [vmem:[%s3745_s3 + $0x38] sm:$0xff] (!%p2405_p6), %v2171_v46 }
 0x678   : > { %2158 = vst [vmem:[#allocation2 + $0x58] sm:$0xff] %v2150_v40  ;;  %v2987_v35 = vpop.f32.mrb[88].mxu1  ;;  %2189 = vst [vmem:[%s3745_s3 + $0x28] sm:$0xff] (!%p2405_p6), %v2169_v45 }
 0x679   : > { %v2126_v10 = vadd.f32 %v4533_v42, %v2987_v35  ;;  %v2117_v4 = vpop.f32.mrb[89].mxu1 }
 0x67a   : > { %v2118_v49 = vadd.f32 %v4533_v42, %v2117_v4  ;;  %v2988_v33 = vpop.f32.mrb[90].mxu1 }
 0x67b   : > { %v2174_v22 = vadd.f32 %v2126_v10, %v4525_v51  ;;  %v2129_v57 = vadd.f32 %v4533_v42, %v2988_v33  ;;  %v2120_v32 = vpop.f32.mrb[91].mxu1 }
 0x67c   : > { %v2172_v54 = vadd.f32 %v2118_v49, %v4530_v0  ;;  %v2121_v1 = vadd.f32 %v4533_v42, %v2120_v32 }
 0x67d   : > { %v2153_v11 = vpack.c.bf16 %v2129_v57, %v2126_v10  ;;  %v2175_v27 = vadd.f32 %v2129_v57, %v4536_v2  ;;  %2194 = vst [vmem:[%s3745_s3 + $0x50] sm:$0xff] (!%p2405_p6), %v2174_v22 }
 0x67e   : > { %v2152_v18 = vpack.c.bf16 %v2121_v1, %v2118_v49  ;;  %v2173_v47 = vadd.f32 %v2121_v1, %v4538_v29  ;;  %2192 = vst [vmem:[%s3745_s3 + $0x40] sm:$0xff] (!%p2405_p6), %v2172_v54 }
 0x67f   : > { %2161 = vst [vmem:[#allocation2 + $0xb8] sm:$0xff] %v2153_v11  ;;  %2195 = vst [vmem:[%s3745_s3 + $0x58] sm:$0xff] (!%p2405_p6), %v2175_v27 }
 0x680   : > { %2160 = vst [vmem:[#allocation2 + $0x98] sm:$0xff] %v2152_v18  ;;  %v2991_v55 = vpop.f32.mrb[92].mxu1  ;;  %2193 = vst [vmem:[%s3745_s3 + $0x48] sm:$0xff] (!%p2405_p6), %v2173_v47 }
 0x681   : > { %v2142_v13 = vadd.f32 %v4533_v42, %v2991_v55  ;;  %v2133_v23 = vpop.f32.mrb[93].mxu1 }
 0x682   : > { %v2134_v51 = vadd.f32 %v4533_v42, %v2133_v23  ;;  %v2992_v12 = vpop.f32.mrb[94].mxu1  ;;  %2183 = sbr.rel (%p2405_p6) target bundleno = 1673 (0x689), region = 64 }
 0x683   : > { %v2178_v48 = vadd.f32 %v2142_v13, %v4548_v53  ;;  %v2145_v0 = vadd.f32 %v4533_v42, %v2992_v12  ;;  %v2136_v5 = vpop.f32.mrb[95].mxu1 }
 0x684   : > { %v2176_v25 = vadd.f32 %v2134_v51, %v4553_v9  ;;  %v2137_v2 = vadd.f32 %v4533_v42, %v2136_v5 }
 0x685   : > { %v2155_v31 = vpack.c.bf16 %v2145_v0, %v2142_v13  ;;  %v2179_v29 = vadd.f32 %v2145_v0, %v4556_v50  ;;  %2198 = vst [vmem:[%s3745_s3 + $0x70] sm:$0xff] (!%p2405_p6), %v2178_v48 }
 0x686   : > { %v2154_v62 = vpack.c.bf16 %v2137_v2, %v2134_v51  ;;  %v2177_v39 = vadd.f32 %v2137_v2, %v4558_v19  ;;  %2196 = vst [vmem:[%s3745_s3 + $0x60] sm:$0xff] (!%p2405_p6), %v2176_v25 }
 0x687   : > { %2163 = vst [vmem:[#allocation2 + $0xf8] sm:$0xff] %v2155_v31  ;;  %2199 = vst [vmem:[%s3745_s3 + $0x78] sm:$0xff] (!%p2405_p6), %v2179_v29 }
 0x688   : > { %2162 = vst [vmem:[#allocation2 + $0xd8] sm:$0xff] %v2154_v62  ;;  %2197 = vst [vmem:[%s3745_s3 + $0x68] sm:$0xff] (!%p2405_p6), %v2177_v39 }
 0x689 PF: > { %s4773_s30 = sld [smem:[#allocation29_spill]]  ;;  %s2416_s19 = sshll.u32 %s3406_s8, 11 }
 0x68a   : > { %s4774_s23 = sld [smem:[#allocation45_spill]]  ;;  %s2214_s11 = sshll.u32 %s3745_s3, 4  ;;  %s4632_s11 = int_to_ptr.vmem [resolvable:$true] %s2214_s11 }
 0x68b   : > { %s4775_s0 = sand.u32 1, %s3382_s25   ;;  %s3280_s10 = scalar_lea.vmem %s4632_s11, 2048 }
 0x68c   : > { %s4636_s20 = scalar_lea.sflag [#allocation7], %s4775_s0  ;;  %p3281_p0 = scmp.ne.s32.totalorder %s4632_s11, %s3280_s10 }
 0x68d   : > { %s3435_s8 = smov [#allocation12]  }
 0x68e   : > { %s3284_s7 = sshll.u32 %s3435_s8, 4  ;;  %s3285_s7 = int_to_ptr.vmem [resolvable:$false] %s3284_s7 }
 0x68f   : > { %p4776_p7 = scmp.ne.s32.totalorder %s4773_s30, 0  ;;  %s3286_s14 = scalar_lea.vmem %s3285_s7, 4096 }
 0x690   : > { %s4629_s27 = scalar_lea.hbm %s4774_s23, %s2416_s19  ;;  %p3287_p1 = scmp.lt.s32.totalorder %s4632_s11, %s3285_s7 }
 0x691   : > { %p3282_p4 = pnand %p3281_p0, %p4776_p7  ;;  %p3288_p2 = scmp.lt.s32.totalorder %s3286_s14, %s3280_s10 }
 0x693   : > { %p3283_p13 = pneg %p3282_p4  ;;  %p3289_p3 = por %p3288_p2, %p3287_p1 }
 0x695   : > { %p3290_p10 = pnand %p3289_p3, %p3283_p13 }
 0x697   : > { %3293 = shalt.err (!%p3290_p10)
}
 0x698   : > { %s3294_s3 = scalar_lea.hbm %s4629_s27, 2048  ;;  %s3298_s12 = scalar_lea.hbm %s4774_s23, 4096 }
 0x699   : > { %p3295_p11 = scmp.ne.s32.totalorder %s4629_s27, %s3294_s3  ;;  %p3299_p9 = scmp.lt.u32.totalorder %s4629_s27, %s4774_s23 }
 0x69a   : > { %p3300_p12 = scmp.lt.u32.totalorder %s3298_s12, %s3294_s3  ;;  %p3302_p0 = scmp.lt.u32.totalorder %s3294_s3, %s4629_s27 }
 0x69b   : > { %p3296_p8 = pnand %p3295_p11, %p4776_p7 }
 0x69c   : > { %p3301_p6 = por %p3300_p12, %p3299_p9 }
 0x69d   : > { %p3297_p5 = pneg %p3296_p8 }
 0x69e   : > { %p3303_p4 = por %p3302_p0, %p3301_p6 }
 0x6a0   : > { %p3304_p13 = pnand %p3303_p4, %p3297_p5 }
 0x6a2   : > { %3307 = shalt.err (!%p3304_p13)
}
 0x6a3   : > { %s3436_s1 = smov 128   ;;  %s3437_s5 = smov 8  }
 0x6a4   : > { %3016 = dma.vmem_to_hbm [thread:$0]  (%p4776_p7), %s4632_s11, 2048, %s4629_s27, %s4636_s20, %s3436_s1, %s3436_s1, %s3437_s5  }
 0x6a5 PF: > { %s4777_s15 = sld [smem:[#allocation28_spill]]  ;;  %s4778_s17 = sld [smem:[#allocation26_spill]] }
 0x6a6   : > { %s4779_s19 = sld [smem:[#allocation30_spill]] }
 0x6ab   : > { %p3037_p1 = scmp.ge.s32.totalorder %s4777_s15, 2  ;;  %s2229_s21 = sand.u32 1, %s4778_s17  }
 0x6ac   : > { %p4780_p2 = scmp.ne.s32.totalorder %s4779_s19, 0  ;;  %s2230_s13 = scalar_lea.sflag [#allocation7], %s2229_s21 }
 0x6ae   : > { %p3030_p3 = pnand %p3037_p1, %p4780_p2 }
 0x6b0   : > { %3373 = dma.done.wait (!%p3030_p3), %s2230_s13, 2048  }
 0x6b1   : > { %3375 = vsyncadd (!%p3030_p3), %s2230_s13, 4294965248  ;;  %s27_s11 = sadd.s32 1, %s4777_s15   ;;  %s4781_s30 = sld [smem:[#allocation33_spill]] }
 0x6b2   : > { %p24_p10 = scmp.ge.s32.totalorder %s27_s11, 6   ;;  %s4782_s8 = sld [smem:[#allocation27_spill]] }
 0x6b3   : > { %s4783_s0 = sld [smem:[#allocation31_spill]]  ;;  %s4784_s10 = sld [smem:[#allocation32_spill]] }
 0x6b4   : > { %s4785_s24 = smov %s3382_s25  ;;  %s4786_s25 = smov %s3386_s26 }
 0x6b5   : > { %s4787_s26 = smov %s3635_s2  ;;  %s4788_s27 = smov %s3394_s28 }
 0x6b6   : > { %s4789_s28 = smov %s3398_s29  ;;  %26 = sbr.rel (!%p24_p10) target bundleno = 20 (0x14), region = 132 }
 0x6b7   : > { %s4790_s29 = smov %s4781_s30  ;;  %s4791_s30 = smov %s3410_s9 }
 0x6b9   : > { %s4792_s9 = smov %s4783_s0 }
 0x6bd   :  { %2235 = vsyncpa [#allocation6], 1 }
 0x6be   :  { %2237 = vsyncpa [#allocation6 + $0x1], 1 }
 0x6bf   :  { %2238 = vsyncpa [#allocation11], 1 }
 0x6c0   :  { %2240 = vsyncpa [#allocation11 + $0x1], 1 }
 0x6c1   :  { %2241 = vsyncpa [#allocation7], 1 }
 0x6c2   :  { %2243 = vsyncpa [#allocation7 + $0x1], 1 }
 0x6c3   :  { %2244 = vsyncpa [#allocation8], 1 }
 0x6c4   :  { %2246 = vsyncpa [#allocation8 + $0x1], 1 }
 0x6c5   :  { %2247 = vsyncmov [#allocation4] }
 0x6c8   :  { %s2248_s2 = vpop.sfrf %2247 }
 0x6c9   :  { %p2411_p7 = scmp.ne.s32.totalorder %s2248_s2, 0 }
 0x6cb   :  { %2252 = shalt.err (%p2411_p7)  }
 0x6cc   :  { %2254 = vsyncmov [#allocation4 + $0x1] }
 0x6cf   :  { %s2255_s20 = vpop.sfrf %2254 }
 0x6d0   :  { %p2412_p11 = scmp.ne.s32.totalorder %s2255_s20, 0 }
 0x6d2   :  { %2259 = shalt.err (%p2412_p11)  }

</bundles_post_ra>
